<compile_context>
chip_gen: v6e
topology: v6e:2x2x1
jax: 0.10.0
libtpu: 0.0.40
codegen_flags: <defaults>
</compile_context>

<pallas_src>
import functools
import math

import jax
import jax.numpy as jnp
from jax import lax
from jax.experimental import pallas as pl
from jax.experimental.pallas import tpu as pltpu

EPS = 1e-5


def _whole(shape):
    """Full-array BlockSpec for a grid=(1,) pallas_call."""
    nd = len(shape)
    return pl.BlockSpec(shape, lambda i, _nd=nd: (0,) * _nd)


# ---------------------------------------------------------------------------
# Fused ResBlock kernel
# ---------------------------------------------------------------------------
def _resblock_kernel(xf_ref, w1_ref, ops_ref, wid_ref, wrest_ref, w3_ref, ws_ref,
                     p1_ref, p2_ref, p3_ref, ps_ref,
                     o_ref, *, nbatch, nverts, cneck, cdt):
    B, V, C = nbatch, nverts, cneck

    def mm(a, b):
        # Operands are pre-cast to the compute dtype; f32 accumulation on the MXU.
        return jnp.dot(a, b, preferred_element_type=jnp.float32)

    def bn(y, prm_ref, relu):
        # Training-mode BatchNorm1d over (B, V) per channel, biased variance.
        # Conv biases are dropped upstream (mean subtraction cancels them exactly);
        # centered two-pass variance avoids E[y^2]-mean^2 cancellation.
        gamma, beta = prm_ref[0], prm_ref[1]                  # (Cstage, 1) f32
        inv_n = 1.0 / float(y.shape[1])
        mean = jnp.sum(y, axis=1, keepdims=True) * inv_n
        d = y - mean
        var = jnp.sum(d * d, axis=1, keepdims=True) * inv_n
        out = d * (lax.rsqrt(var + EPS) * gamma) + beta
        if relu:
            out = jnp.maximum(out, 0.0)
        return out

    xf = xf_ref[...]                                          # (Cin, B*V), compute dtype

    # ---- main path: conv1 (1x1) + bn1 + relu --------------------------------------
    h = bn(mm(w1_ref[...], xf), p1_ref, relu=True)            # (C, B*V) f32
    h_c = h.astype(cdt)                                       # cast once per stage

    # ---- MeshConv vertex operators, batch folded into the MXU M dimension ---------
    #   (B*C, V) @ (V, 3V) -> (B*C, 3V) = [lap | ew | ns]   (rows ordered (b, c))
    h_fold = jnp.concatenate([h_c[:, b * V:(b + 1) * V] for b in range(B)], axis=0)
    fb = mm(h_fold, ops_ref[...]).astype(cdt)                 # (B*C, 3V)

    def unfold(f):
        # feature f back to the channels-in-rows, batch-folded-lanes (C, B*V) layout
        return jnp.concatenate(
            [fb[b * C:(b + 1) * C, f * V:(f + 1) * V] for b in range(B)], axis=1)

    feat = jnp.concatenate([unfold(0), unfold(1), unfold(2)], axis=0)   # (3C, B*V)

    # ---- MeshConv coefficients (identity applied to h directly) + bn2 + relu ------
    h2 = bn(mm(wid_ref[...], h_c) + mm(wrest_ref[...], feat), p2_ref, relu=True)
    h2_c = h2.astype(cdt)

    # ---- conv3 + bn3 (main), conv_ + bn_ (skip), residual add + relu --------------
    x1 = bn(mm(w3_ref[...], h2_c), p3_ref, relu=False)        # (Cout, B*V)
    x2 = bn(mm(ws_ref[...], xf), ps_ref, relu=False)          # (Cout, B*V)
    o_ref[...] = jnp.maximum(x1 + x2, 0.0).astype(o_ref.dtype)


def resblock_forward(x, p):
    """Fused ResBlock forward (coarsen=False, diff_chan skip path).

    x: (B, Cin, V) float32; p: dict from prepare_params()."""
    B, Cin, V = x.shape
    Cneck = p["w1"].shape[0]
    Cout = p["w3"].shape[0]
    cdt = p["w1"].dtype

    # Layout plumbing lives in the wrapper: lane-dense (Cin, B*V) input slab,
    # already in the matmul compute dtype.
    xf = x.transpose(1, 0, 2).reshape(Cin, B * V).astype(cdt)

    args = (xf, p["w1"], p["ops_t"], p["w_id"], p["w_rest"], p["w3"], p["w_"],
            p["p1"], p["p2"], p["p3"], p["p_"])
    kernel = functools.partial(_resblock_kernel, nbatch=B, nverts=V,
                               cneck=Cneck, cdt=cdt)
    out = pl.pallas_call(
        kernel,
        out_shape=jax.ShapeDtypeStruct((Cout, B * V), jnp.float32),
        grid=(1,),
        in_specs=[_whole(a.shape) for a in args],
        out_specs=_whole((Cout, B * V)),
        compiler_params=pltpu.CompilerParams(
            dimension_semantics=("arbitrary",)),
    )(*args)
    # lane-dense (Cout, B*V) slab back to the module's (B, Cout, V) layout
    return out.reshape(Cout, B, V).transpose(1, 0, 2)


# ---------------------------------------------------------------------------
# Host-side parameter preparation (composite operators, split coefficients)
# ---------------------------------------------------------------------------
def prepare_params(raw, compute_dtype=jnp.bfloat16):
    G, L, F2V, EW, NS = raw["G"], raw["L"], raw["F2V"], raw["EW"], raw["NS"]
    F = EW.shape[0]
    # M_ew[v,u] = sum_{f,k} F2V[v,f] * EW[f,k] * G[k*F+f, u]   (and same for NS)
    S_ew = EW[:, 0:1] * G[0:F] + EW[:, 1:2] * G[F:2 * F] + EW[:, 2:3] * G[2 * F:3 * F]
    S_ns = NS[:, 0:1] * G[0:F] + NS[:, 1:2] * G[F:2 * F] + NS[:, 2:3] * G[2 * F:3 * F]
    M_ew = F2V @ S_ew                                       # (V, V)
    M_ns = F2V @ S_ns                                       # (V, V)
    ops_t = jnp.concatenate([L.T, M_ew.T, M_ns.T], axis=1)  # (V, 3V)

    coeffs = raw["coeffs"]                                  # (Cout, Cin, 4): [id,lap,ew,ns]
    w_id = coeffs[:, :, 0]                                  # (Cout, Cin)
    w_rest = jnp.transpose(coeffs[:, :, 1:], (0, 2, 1)).reshape(coeffs.shape[0], -1)

    def stage(g, be):
        return jnp.stack([g, be], axis=0).reshape(2, g.shape[0], 1).astype(jnp.float32)

    # NOTE: conv/MeshConv biases are intentionally NOT shipped to the kernel:
    # training-mode BN mean subtraction cancels a per-channel pre-BN bias exactly.
    return {
        "w1": raw["w1"].astype(compute_dtype),
        "ops_t": ops_t.astype(compute_dtype),
        "w_id": w_id.astype(compute_dtype),
        "w_rest": w_rest.astype(compute_dtype),
        "w3": raw["w3"].astype(compute_dtype),
        "w_": raw["w_"].astype(compute_dtype),
        "p1": stage(raw["g1"], raw["be1"]),
        "p2": stage(raw["g2"], raw["be2"]),
        "p3": stage(raw["g3"], raw["be3"]),
        "p_": stage(raw["g_"], raw["be_"]),
    }


# ---------------------------------------------------------------------------
# Pure-JAX reference following the original (unfused) PyTorch formulation
# ---------------------------------------------------------------------------
def _bn_ref(y, g, be):
    mean = jnp.mean(y, axis=(0, 2), keepdims=True)
    var = jnp.mean(jnp.square(y - mean), axis=(0, 2), keepdims=True)
    return (y - mean) * lax.rsqrt(var + EPS) * g.reshape(1, -1, 1) + be.reshape(1, -1, 1)


def resblock_reference(x, raw):
    def conv1x1(t, w, b):
        return jnp.einsum("oc,bcv->bov", w, t) + b.reshape(1, -1, 1)

    h = jax.nn.relu(_bn_ref(conv1x1(x, raw["w1"], raw["b1"]), raw["g1"], raw["be1"]))

    G, L, F2V, EW, NS = raw["G"], raw["L"], raw["F2V"], raw["EW"], raw["NS"]
    F = EW.shape[0]
    B, C, V = h.shape
    gf = jnp.einsum("fv,bcv->bcf", G, h).reshape(B, C, 3, F).transpose(0, 1, 3, 2)
    lap = jnp.einsum("wv,bcv->bcw", L, h)
    gv_ew = jnp.einsum("vf,bcf->bcv", F2V, jnp.sum(gf * EW, axis=-1))
    gv_ns = jnp.einsum("vf,bcf->bcv", F2V, jnp.sum(gf * NS, axis=-1))
    feat = jnp.stack([h, lap, gv_ew, gv_ns], axis=-1)
    y = jnp.einsum("oik,bivk->bov", raw["coeffs"], feat) + raw["mc_bias"].reshape(1, -1, 1)
    h2 = jax.nn.relu(_bn_ref(y, raw["g2"], raw["be2"]))

    x1 = _bn_ref(conv1x1(h2, raw["w3"], raw["b3"]), raw["g3"], raw["be3"])
    x2 = _bn_ref(conv1x1(x, raw["w_"], raw["b_"]), raw["g_"], raw["be_"])
    return jax.nn.relu(x1 + x2)


# ---------------------------------------------------------------------------
# Demo / self-check
# ---------------------------------------------------------------------------
if __name__ == "__main__":
    B, IN_CHAN, NECK_CHAN, OUT_CHAN = 2, 8, 16, 32
    NV, NF = 256, 512    # synthetic icosphere: vertices / faces (stride=1 => nv_prev = NV)

    key = jax.random.PRNGKey(0)
    ks = jax.random.split(key, 16)

    x = jax.random.normal(ks[0], (B, IN_CHAN, NV), jnp.float32)

    k1 = 1.0 / math.sqrt(IN_CHAN)
    k3 = 1.0 / math.sqrt(NECK_CHAN)
    kc = 1.0 / math.sqrt(NECK_CHAN * 4)

    def uni(k, shape, s):
        return jax.random.uniform(k, shape, jnp.float32, -s, s)

    raw = {
        # conv1 + bn1
        "w1": uni(ks[1], (NECK_CHAN, IN_CHAN), k1),
        "b1": uni(ks[2], (NECK_CHAN,), k1),
        "g1": jnp.ones((NECK_CHAN,), jnp.float32),
        "be1": jnp.zeros((NECK_CHAN,), jnp.float32),
        # synthetic mesh operators (stand-ins for the icosphere .pkl sparse buffers)
        "G": jax.random.normal(ks[3], (3 * NF, NV), jnp.float32) * 0.1,
        "L": jax.random.normal(ks[4], (NV, NV), jnp.float32) * 0.05,
        "F2V": jax.random.normal(ks[5], (NV, NF), jnp.float32) * 0.1,
        "EW": jax.random.normal(ks[6], (NF, 3), jnp.float32),
        "NS": jax.random.normal(ks[7], (NF, 3), jnp.float32),
        # MeshConv (conv2) + bn2
        "coeffs": uni(ks[8], (NECK_CHAN, NECK_CHAN, 4), kc),
        "mc_bias": uni(ks[9], (NECK_CHAN,), kc),
        "g2": jnp.ones((NECK_CHAN,), jnp.float32),
        "be2": jnp.zeros((NECK_CHAN,), jnp.float32),
        # conv3 + bn3
        "w3": uni(ks[10], (OUT_CHAN, NECK_CHAN), k3),
        "b3": uni(ks[11], (OUT_CHAN,), k3),
        "g3": jnp.ones((OUT_CHAN,), jnp.float32),
        "be3": jnp.zeros((OUT_CHAN,), jnp.float32),
        # skip path conv_ + bn_
        "w_": uni(ks[12], (OUT_CHAN, IN_CHAN), k1),
        "b_": uni(ks[13], (OUT_CHAN,), k1),
        "g_": jnp.ones((OUT_CHAN,), jnp.float32),
        "be_": jnp.zeros((OUT_CHAN,), jnp.float32),
    }

    fwd = jax.jit(resblock_forward)
    ref = jax.block_until_ready(resblock_reference(x, raw))

    # f32 compute path: validates fusion, operator pre-composition, bias cancellation.
    out_f32 = jax.block_until_ready(fwd(x, prepare_params(raw, jnp.float32)))
    assert out_f32.shape == (B, OUT_CHAN, NV), out_f32.shape
    assert bool(jnp.all(jnp.isfinite(out_f32)))
    assert float(jnp.max(jnp.abs(out_f32 - ref))) < 5e-3

    # bf16 compute path (MXU-friendly default for v5e/v6e/v7x), f32 accumulation.
    out = jax.block_until_ready(fwd(x, prepare_params(raw, jnp.bfloat16)))
    assert out.shape == (B, OUT_CHAN, NV), out.shape
    assert bool(jnp.all(jnp.isfinite(out)))
    assert bool(jnp.all(out >= 0.0))           # final ReLU
    assert float(jnp.max(jnp.abs(out - ref))) < 0.25

    print("KERNEL_OK")
</pallas_src>

<mosaic_0001>
module attributes {stable_mosaic.version = 11 : i64} {
  func.func @_resblock_kernel(%arg0: i32, %arg1: memref<8x512xf32, #tpu.memory_space<vmem>>, %arg2: memref<16x8xf32, #tpu.memory_space<vmem>>, %arg3: memref<256x768xf32, #tpu.memory_space<vmem>>, %arg4: memref<16x16xf32, #tpu.memory_space<vmem>>, %arg5: memref<16x48xf32, #tpu.memory_space<vmem>>, %arg6: memref<32x16xf32, #tpu.memory_space<vmem>>, %arg7: memref<32x8xf32, #tpu.memory_space<vmem>>, %arg8: memref<2x16x1xf32, #tpu.memory_space<vmem>>, %arg9: memref<2x16x1xf32, #tpu.memory_space<vmem>>, %arg10: memref<2x32x1xf32, #tpu.memory_space<vmem>>, %arg11: memref<2x32x1xf32, #tpu.memory_space<vmem>>, %arg12: memref<32x512xf32, #tpu.memory_space<vmem>>) attributes {dimension_semantics = [#tpu.dimension_semantics<arbitrary>], iteration_bounds = array<i64: 1>, scalar_prefetch = 0 : i64, scratch_operands = 0 : i64, tpu.core_type = #tpu.core_type<tc>, window_params = [{pipeline_mode = #tpu.pipeline_mode<synchronous>, transform_indices = @transform_0, window_bounds = array<i64: 8, 512>}, {pipeline_mode = #tpu.pipeline_mode<synchronous>, transform_indices = @transform_1, window_bounds = array<i64: 16, 8>}, {pipeline_mode = #tpu.pipeline_mode<synchronous>, transform_indices = @transform_2, window_bounds = array<i64: 256, 768>}, {pipeline_mode = #tpu.pipeline_mode<synchronous>, transform_indices = @transform_3, window_bounds = array<i64: 16, 16>}, {pipeline_mode = #tpu.pipeline_mode<synchronous>, transform_indices = @transform_4, window_bounds = array<i64: 16, 48>}, {pipeline_mode = #tpu.pipeline_mode<synchronous>, transform_indices = @transform_5, window_bounds = array<i64: 32, 16>}, {pipeline_mode = #tpu.pipeline_mode<synchronous>, transform_indices = @transform_6, window_bounds = array<i64: 32, 8>}, {pipeline_mode = #tpu.pipeline_mode<synchronous>, transform_indices = @transform_7, window_bounds = array<i64: 2, 16, 1>}, {pipeline_mode = #tpu.pipeline_mode<synchronous>, transform_indices = @transform_8, window_bounds = array<i64: 2, 16, 1>}, {pipeline_mode = #tpu.pipeline_mode<synchronous>, transform_indices = @transform_9, window_bounds = array<i64: 2, 32, 1>}, {pipeline_mode = #tpu.pipeline_mode<synchronous>, transform_indices = @transform_10, window_bounds = array<i64: 2, 32, 1>}, {pipeline_mode = #tpu.pipeline_mode<synchronous>, transform_indices = @transform_11, window_bounds = array<i64: 32, 512>}]} {
    %c0 = arith.constant 0 : index
    %c0_0 = arith.constant 0 : index
    %0 = vector.load %arg1[%c0, %c0_0] : memref<8x512xf32, #tpu.memory_space<vmem>>, vector<8x512xf32>
    %c0_1 = arith.constant 0 : index
    %c0_2 = arith.constant 0 : index
    %1 = vector.load %arg2[%c0_1, %c0_2] : memref<16x8xf32, #tpu.memory_space<vmem>>, vector<16x8xf32>
    %cst = arith.constant dense<0.000000e+00> : vector<16x512xf32>
    %2 = tpu.matmul %1, %0, %cst {dimension_numbers = #tpu.dot_dimension_numbers<[1], [0], [0], [1], [0, 0, 1, 1], [], []>} : vector<16x8xf32>, vector<8x512xf32>, vector<16x512xf32> -> vector<16x512xf32>
    %c0_3 = arith.constant 0 : index
    %c0_4 = arith.constant 0 : index
    %c0_5 = arith.constant 0 : index
    %3 = vector.load %arg8[%c0_3, %c0_4, %c0_5] : memref<2x16x1xf32, #tpu.memory_space<vmem>>, vector<1x16x1xf32>
    %4 = vector.shape_cast %3 : vector<1x16x1xf32> to vector<16x1xf32>
    %c1 = arith.constant 1 : index
    %c0_6 = arith.constant 0 : index
    %c0_7 = arith.constant 0 : index
    %5 = vector.load %arg8[%c1, %c0_6, %c0_7] : memref<2x16x1xf32, #tpu.memory_space<vmem>>, vector<1x16x1xf32>
    %6 = vector.shape_cast %5 : vector<1x16x1xf32> to vector<16x1xf32>
    %cst_8 = arith.constant dense<0.000000e+00> : vector<16xf32>
    %7 = vector.multi_reduction <add>, %2, %cst_8 [1] : vector<16x512xf32> to vector<16xf32>
    %8 = vector.shape_cast %7 : vector<16xf32> to vector<16x1xf32>
    %cst_9 = arith.constant 0.001953125 : f32
    %9 = vector.broadcast %cst_9 : f32 to vector<16x1xf32>
    %10 = arith.mulf %8, %9 : vector<16x1xf32>
    %11 = vector.broadcast %10 : vector<16x1xf32> to vector<16x512xf32>
    %12 = arith.subf %2, %11 : vector<16x512xf32>
    %13 = arith.mulf %12, %12 : vector<16x512xf32>
    %cst_10 = arith.constant dense<0.000000e+00> : vector<16xf32>
    %14 = vector.multi_reduction <add>, %13, %cst_10 [1] : vector<16x512xf32> to vector<16xf32>
    %15 = vector.shape_cast %14 : vector<16xf32> to vector<16x1xf32>
    %cst_11 = arith.constant 0.001953125 : f32
    %16 = vector.broadcast %cst_11 : f32 to vector<16x1xf32>
    %17 = arith.mulf %15, %16 : vector<16x1xf32>
    %cst_12 = arith.constant 9.99999974E-6 : f32
    %18 = vector.broadcast %cst_12 : f32 to vector<16x1xf32>
    %19 = arith.addf %17, %18 : vector<16x1xf32>
    %20 = math.rsqrt %19 : vector<16x1xf32>
    %21 = arith.mulf %20, %4 : vector<16x1xf32>
    %22 = vector.broadcast %21 : vector<16x1xf32> to vector<16x512xf32>
    %23 = arith.mulf %12, %22 : vector<16x512xf32>
    %24 = vector.broadcast %6 : vector<16x1xf32> to vector<16x512xf32>
    %25 = arith.addf %23, %24 : vector<16x512xf32>
    %cst_13 = arith.constant 0.000000e+00 : f32
    %26 = vector.broadcast %cst_13 : f32 to vector<16x512xf32>
    %27 = arith.maximumf %25, %26 : vector<16x512xf32>
    %28 = vector.extract_strided_slice %27 {offsets = [0, 0], sizes = [16, 256], strides = [1, 1]} : vector<16x512xf32> to vector<16x256xf32>
    %29 = vector.extract_strided_slice %27 {offsets = [0, 256], sizes = [16, 256], strides = [1, 1]} : vector<16x512xf32> to vector<16x256xf32>
    %30 = tpu.concatenate %28, %29 in 0 : vector<16x256xf32>, vector<16x256xf32> -> vector<32x256xf32>
    %c0_14 = arith.constant 0 : index
    %c0_15 = arith.constant 0 : index
    %31 = vector.load %arg3[%c0_14, %c0_15] : memref<256x768xf32, #tpu.memory_space<vmem>>, vector<256x768xf32>
    %cst_16 = arith.constant dense<0.000000e+00> : vector<32x768xf32>
    %32 = tpu.matmul %30, %31, %cst_16 {dimension_numbers = #tpu.dot_dimension_numbers<[1], [0], [0], [1], [0, 0, 1, 1], [], []>} : vector<32x256xf32>, vector<256x768xf32>, vector<32x768xf32> -> vector<32x768xf32>
    %33 = vector.extract_strided_slice %32 {offsets = [0, 0], sizes = [16, 256], strides = [1, 1]} : vector<32x768xf32> to vector<16x256xf32>
    %34 = vector.extract_strided_slice %32 {offsets = [16, 0], sizes = [16, 256], strides = [1, 1]} : vector<32x768xf32> to vector<16x256xf32>
    %35 = tpu.concatenate %33, %34 in 1 : vector<16x256xf32>, vector<16x256xf32> -> vector<16x512xf32>
    %36 = vector.extract_strided_slice %32 {offsets = [0, 256], sizes = [16, 256], strides = [1, 1]} : vector<32x768xf32> to vector<16x256xf32>
    %37 = vector.extract_strided_slice %32 {offsets = [16, 256], sizes = [16, 256], strides = [1, 1]} : vector<32x768xf32> to vector<16x256xf32>
    %38 = tpu.concatenate %36, %37 in 1 : vector<16x256xf32>, vector<16x256xf32> -> vector<16x512xf32>
    %39 = vector.extract_strided_slice %32 {offsets = [0, 512], sizes = [16, 256], strides = [1, 1]} : vector<32x768xf32> to vector<16x256xf32>
    %40 = vector.extract_strided_slice %32 {offsets = [16, 512], sizes = [16, 256], strides = [1, 1]} : vector<32x768xf32> to vector<16x256xf32>
    %41 = tpu.concatenate %39, %40 in 1 : vector<16x256xf32>, vector<16x256xf32> -> vector<16x512xf32>
    %42 = tpu.concatenate %35, %38, %41 in 0 : vector<16x512xf32>, vector<16x512xf32>, vector<16x512xf32> -> vector<48x512xf32>
    %c0_17 = arith.constant 0 : index
    %c0_18 = arith.constant 0 : index
    %43 = vector.load %arg4[%c0_17, %c0_18] : memref<16x16xf32, #tpu.memory_space<vmem>>, vector<16x16xf32>
    %cst_19 = arith.constant dense<0.000000e+00> : vector<16x512xf32>
    %44 = tpu.matmul %43, %27, %cst_19 {dimension_numbers = #tpu.dot_dimension_numbers<[1], [0], [0], [1], [0, 0, 1, 1], [], []>} : vector<16x16xf32>, vector<16x512xf32>, vector<16x512xf32> -> vector<16x512xf32>
    %c0_20 = arith.constant 0 : index
    %c0_21 = arith.constant 0 : index
    %45 = vector.load %arg5[%c0_20, %c0_21] : memref<16x48xf32, #tpu.memory_space<vmem>>, vector<16x48xf32>
    %cst_22 = arith.constant dense<0.000000e+00> : vector<16x512xf32>
    %46 = tpu.matmul %45, %42, %cst_22 {dimension_numbers = #tpu.dot_dimension_numbers<[1], [0], [0], [1], [0, 0, 1, 1], [], []>} : vector<16x48xf32>, vector<48x512xf32>, vector<16x512xf32> -> vector<16x512xf32>
    %47 = arith.addf %44, %46 : vector<16x512xf32>
    %c0_23 = arith.constant 0 : index
    %c0_24 = arith.constant 0 : index
    %c0_25 = arith.constant 0 : index
    %48 = vector.load %arg9[%c0_23, %c0_24, %c0_25] : memref<2x16x1xf32, #tpu.memory_space<vmem>>, vector<1x16x1xf32>
    %49 = vector.shape_cast %48 : vector<1x16x1xf32> to vector<16x1xf32>
    %c1_26 = arith.constant 1 : index
    %c0_27 = arith.constant 0 : index
    %c0_28 = arith.constant 0 : index
    %50 = vector.load %arg9[%c1_26, %c0_27, %c0_28] : memref<2x16x1xf32, #tpu.memory_space<vmem>>, vector<1x16x1xf32>
    %51 = vector.shape_cast %50 : vector<1x16x1xf32> to vector<16x1xf32>
    %cst_29 = arith.constant dense<0.000000e+00> : vector<16xf32>
    %52 = vector.multi_reduction <add>, %47, %cst_29 [1] : vector<16x512xf32> to vector<16xf32>
    %53 = vector.shape_cast %52 : vector<16xf32> to vector<16x1xf32>
    %cst_30 = arith.constant 0.001953125 : f32
    %54 = vector.broadcast %cst_30 : f32 to vector<16x1xf32>
    %55 = arith.mulf %53, %54 : vector<16x1xf32>
    %56 = vector.broadcast %55 : vector<16x1xf32> to vector<16x512xf32>
    %57 = arith.subf %47, %56 : vector<16x512xf32>
    %58 = arith.mulf %57, %57 : vector<16x512xf32>
    %cst_31 = arith.constant dense<0.000000e+00> : vector<16xf32>
    %59 = vector.multi_reduction <add>, %58, %cst_31 [1] : vector<16x512xf32> to vector<16xf32>
    %60 = vector.shape_cast %59 : vector<16xf32> to vector<16x1xf32>
    %cst_32 = arith.constant 0.001953125 : f32
    %61 = vector.broadcast %cst_32 : f32 to vector<16x1xf32>
    %62 = arith.mulf %60, %61 : vector<16x1xf32>
    %cst_33 = arith.constant 9.99999974E-6 : f32
    %63 = vector.broadcast %cst_33 : f32 to vector<16x1xf32>
    %64 = arith.addf %62, %63 : vector<16x1xf32>
    %65 = math.rsqrt %64 : vector<16x1xf32>
    %66 = arith.mulf %65, %49 : vector<16x1xf32>
    %67 = vector.broadcast %66 : vector<16x1xf32> to vector<16x512xf32>
    %68 = arith.mulf %57, %67 : vector<16x512xf32>
    %69 = vector.broadcast %51 : vector<16x1xf32> to vector<16x512xf32>
    %70 = arith.addf %68, %69 : vector<16x512xf32>
    %cst_34 = arith.constant 0.000000e+00 : f32
    %71 = vector.broadcast %cst_34 : f32 to vector<16x512xf32>
    %72 = arith.maximumf %70, %71 : vector<16x512xf32>
    %c0_35 = arith.constant 0 : index
    %c0_36 = arith.constant 0 : index
    %73 = vector.load %arg6[%c0_35, %c0_36] : memref<32x16xf32, #tpu.memory_space<vmem>>, vector<32x16xf32>
    %cst_37 = arith.constant dense<0.000000e+00> : vector<32x512xf32>
    %74 = tpu.matmul %73, %72, %cst_37 {dimension_numbers = #tpu.dot_dimension_numbers<[1], [0], [0], [1], [0, 0, 1, 1], [], []>} : vector<32x16xf32>, vector<16x512xf32>, vector<32x512xf32> -> vector<32x512xf32>
    %c0_38 = arith.constant 0 : index
    %c0_39 = arith.constant 0 : index
    %c0_40 = arith.constant 0 : index
    %75 = vector.load %arg10[%c0_38, %c0_39, %c0_40] : memref<2x32x1xf32, #tpu.memory_space<vmem>>, vector<1x32x1xf32>
    %76 = vector.shape_cast %75 : vector<1x32x1xf32> to vector<32x1xf32>
    %c1_41 = arith.constant 1 : index
    %c0_42 = arith.constant 0 : index
    %c0_43 = arith.constant 0 : index
    %77 = vector.load %arg10[%c1_41, %c0_42, %c0_43] : memref<2x32x1xf32, #tpu.memory_space<vmem>>, vector<1x32x1xf32>
    %78 = vector.shape_cast %77 : vector<1x32x1xf32> to vector<32x1xf32>
    %cst_44 = arith.constant dense<0.000000e+00> : vector<32xf32>
    %79 = vector.multi_reduction <add>, %74, %cst_44 [1] : vector<32x512xf32> to vector<32xf32>
    %80 = vector.shape_cast %79 : vector<32xf32> to vector<32x1xf32>
    %cst_45 = arith.constant 0.001953125 : f32
    %81 = vector.broadcast %cst_45 : f32 to vector<32x1xf32>
    %82 = arith.mulf %80, %81 : vector<32x1xf32>
    %83 = vector.broadcast %82 : vector<32x1xf32> to vector<32x512xf32>
    %84 = arith.subf %74, %83 : vector<32x512xf32>
    %85 = arith.mulf %84, %84 : vector<32x512xf32>
    %cst_46 = arith.constant dense<0.000000e+00> : vector<32xf32>
    %86 = vector.multi_reduction <add>, %85, %cst_46 [1] : vector<32x512xf32> to vector<32xf32>
    %87 = vector.shape_cast %86 : vector<32xf32> to vector<32x1xf32>
    %cst_47 = arith.constant 0.001953125 : f32
    %88 = vector.broadcast %cst_47 : f32 to vector<32x1xf32>
    %89 = arith.mulf %87, %88 : vector<32x1xf32>
    %cst_48 = arith.constant 9.99999974E-6 : f32
    %90 = vector.broadcast %cst_48 : f32 to vector<32x1xf32>
    %91 = arith.addf %89, %90 : vector<32x1xf32>
    %92 = math.rsqrt %91 : vector<32x1xf32>
    %93 = arith.mulf %92, %76 : vector<32x1xf32>
    %94 = vector.broadcast %93 : vector<32x1xf32> to vector<32x512xf32>
    %95 = arith.mulf %84, %94 : vector<32x512xf32>
    %96 = vector.broadcast %78 : vector<32x1xf32> to vector<32x512xf32>
    %97 = arith.addf %95, %96 : vector<32x512xf32>
    %c0_49 = arith.constant 0 : index
    %c0_50 = arith.constant 0 : index
    %98 = vector.load %arg7[%c0_49, %c0_50] : memref<32x8xf32, #tpu.memory_space<vmem>>, vector<32x8xf32>
    %cst_51 = arith.constant dense<0.000000e+00> : vector<32x512xf32>
    %99 = tpu.matmul %98, %0, %cst_51 {dimension_numbers = #tpu.dot_dimension_numbers<[1], [0], [0], [1], [0, 0, 1, 1], [], []>} : vector<32x8xf32>, vector<8x512xf32>, vector<32x512xf32> -> vector<32x512xf32>
    %c0_52 = arith.constant 0 : index
    %c0_53 = arith.constant 0 : index
    %c0_54 = arith.constant 0 : index
    %100 = vector.load %arg11[%c0_52, %c0_53, %c0_54] : memref<2x32x1xf32, #tpu.memory_space<vmem>>, vector<1x32x1xf32>
    %101 = vector.shape_cast %100 : vector<1x32x1xf32> to vector<32x1xf32>
    %c1_55 = arith.constant 1 : index
    %c0_56 = arith.constant 0 : index
    %c0_57 = arith.constant 0 : index
    %102 = vector.load %arg11[%c1_55, %c0_56, %c0_57] : memref<2x32x1xf32, #tpu.memory_space<vmem>>, vector<1x32x1xf32>
    %103 = vector.shape_cast %102 : vector<1x32x1xf32> to vector<32x1xf32>
    %cst_58 = arith.constant dense<0.000000e+00> : vector<32xf32>
    %104 = vector.multi_reduction <add>, %99, %cst_58 [1] : vector<32x512xf32> to vector<32xf32>
    %105 = vector.shape_cast %104 : vector<32xf32> to vector<32x1xf32>
    %cst_59 = arith.constant 0.001953125 : f32
    %106 = vector.broadcast %cst_59 : f32 to vector<32x1xf32>
    %107 = arith.mulf %105, %106 : vector<32x1xf32>
    %108 = vector.broadcast %107 : vector<32x1xf32> to vector<32x512xf32>
    %109 = arith.subf %99, %108 : vector<32x512xf32>
    %110 = arith.mulf %109, %109 : vector<32x512xf32>
    %cst_60 = arith.constant dense<0.000000e+00> : vector<32xf32>
    %111 = vector.multi_reduction <add>, %110, %cst_60 [1] : vector<32x512xf32> to vector<32xf32>
    %112 = vector.shape_cast %111 : vector<32xf32> to vector<32x1xf32>
    %cst_61 = arith.constant 0.001953125 : f32
    %113 = vector.broadcast %cst_61 : f32 to vector<32x1xf32>
    %114 = arith.mulf %112, %113 : vector<32x1xf32>
    %cst_62 = arith.constant 9.99999974E-6 : f32
    %115 = vector.broadcast %cst_62 : f32 to vector<32x1xf32>
    %116 = arith.addf %114, %115 : vector<32x1xf32>
    %117 = math.rsqrt %116 : vector<32x1xf32>
    %118 = arith.mulf %117, %101 : vector<32x1xf32>
    %119 = vector.broadcast %118 : vector<32x1xf32> to vector<32x512xf32>
    %120 = arith.mulf %109, %119 : vector<32x512xf32>
    %121 = vector.broadcast %103 : vector<32x1xf32> to vector<32x512xf32>
    %122 = arith.addf %120, %121 : vector<32x512xf32>
    %123 = arith.addf %97, %122 : vector<32x512xf32>
    %cst_63 = arith.constant 0.000000e+00 : f32
    %124 = vector.broadcast %cst_63 : f32 to vector<32x512xf32>
    %125 = arith.maximumf %123, %124 : vector<32x512xf32>
    %c0_64 = arith.constant 0 : index
    %c0_65 = arith.constant 0 : index
    %126 = vector.load %arg12[%c0_64, %c0_65] : memref<32x512xf32, #tpu.memory_space<vmem>>, vector<32x512xf32>
    tpu.vector_store %arg12[%c0_64, %c0_65], %125 {strides = array<i32>} : memref<32x512xf32, #tpu.memory_space<vmem>>, vector<32x512xf32>,
    return
  }
  func.func @transform_0(%arg0: i32) -> (i32, i32) {
    %c0_i32 = arith.constant 0 : i32
    %c0_i32_0 = arith.constant 0 : i32
    %c0_i32_1 = arith.constant 0 : i32
    return %c0_i32, %c0_i32_0 : i32, i32
  }
  func.func @transform_1(%arg0: i32) -> (i32, i32) {
    %c0_i32 = arith.constant 0 : i32
    %c0_i32_0 = arith.constant 0 : i32
    %c0_i32_1 = arith.constant 0 : i32
    return %c0_i32, %c0_i32_0 : i32, i32
  }
  func.func @transform_2(%arg0: i32) -> (i32, i32) {
    %c0_i32 = arith.constant 0 : i32
    %c0_i32_0 = arith.constant 0 : i32
    %c0_i32_1 = arith.constant 0 : i32
    return %c0_i32, %c0_i32_0 : i32, i32
  }
  func.func @transform_3(%arg0: i32) -> (i32, i32) {
    %c0_i32 = arith.constant 0 : i32
    %c0_i32_0 = arith.constant 0 : i32
    %c0_i32_1 = arith.constant 0 : i32
    return %c0_i32, %c0_i32_0 : i32, i32
  }
  func.func @transform_4(%arg0: i32) -> (i32, i32) {
    %c0_i32 = arith.constant 0 : i32
    %c0_i32_0 = arith.constant 0 : i32
    %c0_i32_1 = arith.constant 0 : i32
    return %c0_i32, %c0_i32_0 : i32, i32
  }
  func.func @transform_5(%arg0: i32) -> (i32, i32) {
    %c0_i32 = arith.constant 0 : i32
    %c0_i32_0 = arith.constant 0 : i32
    %c0_i32_1 = arith.constant 0 : i32
    return %c0_i32, %c0_i32_0 : i32, i32
  }
  func.func @transform_6(%arg0: i32) -> (i32, i32) {
    %c0_i32 = arith.constant 0 : i32
    %c0_i32_0 = arith.constant 0 : i32
    %c0_i32_1 = arith.constant 0 : i32
    return %c0_i32, %c0_i32_0 : i32, i32
  }
  func.func @transform_7(%arg0: i32) -> (i32, i32, i32) {
    %c0_i32 = arith.constant 0 : i32
    %c0_i32_0 = arith.constant 0 : i32
    %c0_i32_1 = arith.constant 0 : i32
    %c0_i32_2 = arith.constant 0 : i32
    return %c0_i32, %c0_i32_0, %c0_i32_1 : i32, i32, i32
  }
  func.func @transform_8(%arg0: i32) -> (i32, i32, i32) {
    %c0_i32 = arith.constant 0 : i32
    %c0_i32_0 = arith.constant 0 : i32
    %c0_i32_1 = arith.constant 0 : i32
    %c0_i32_2 = arith.constant 0 : i32
    return %c0_i32, %c0_i32_0, %c0_i32_1 : i32, i32, i32
  }
  func.func @transform_9(%arg0: i32) -> (i32, i32, i32) {
    %c0_i32 = arith.constant 0 : i32
    %c0_i32_0 = arith.constant 0 : i32
    %c0_i32_1 = arith.constant 0 : i32
    %c0_i32_2 = arith.constant 0 : i32
    return %c0_i32, %c0_i32_0, %c0_i32_1 : i32, i32, i32
  }
  func.func @transform_10(%arg0: i32) -> (i32, i32, i32) {
    %c0_i32 = arith.constant 0 : i32
    %c0_i32_0 = arith.constant 0 : i32
    %c0_i32_1 = arith.constant 0 : i32
    %c0_i32_2 = arith.constant 0 : i32
    return %c0_i32, %c0_i32_0, %c0_i32_1 : i32, i32, i32
  }
  func.func @transform_11(%arg0: i32) -> (i32, i32) {
    %c0_i32 = arith.constant 0 : i32
    %c0_i32_0 = arith.constant 0 : i32
    %c0_i32_1 = arith.constant 0 : i32
    return %c0_i32, %c0_i32_0 : i32, i32
  }
}

</mosaic_0001>

<bundles_post_ra>
// kernel: resblock_forward.1
= control target key start
LH: loop header
LB: loop body
LE: loop exit
PB: predicated region body
PF: predicated region fallthrough
CT: control target
= control target key end

     0   :  { %16 = vsyncpa [#allocation3], 0  ;;  %s2078_s17 = smov [#allocation2]   ;;  %s2786_s0 = inlined_call_operand.vmem [shape: f32[8,512], index: 0, kind: input, shape index: {}]   ;;  %s2787_s1 = inlined_call_operand.vmem [shape: f32[16,8], index: 1, kind: input, shape index: {}]   ;;  %s2788_s2 = inlined_call_operand.hbm [shape: f32[256,768], index: 2, kind: input, shape index: {}]   ;;  %s2789_s3 = inlined_call_operand.vmem [shape: f32[16,16], index: 3, kind: input, shape index: {}]   ;;  %s2790_s4 = inlined_call_operand.vmem [shape: f32[16,48], index: 4, kind: input, shape index: {}]   ;;  %s2791_s5 = inlined_call_operand.vmem [shape: f32[32,16], index: 5, kind: input, shape index: {}]   ;;  %s2792_s6 = inlined_call_operand.vmem [shape: f32[32,8], index: 6, kind: input, shape index: {}]   ;;  %s2793_s7 = inlined_call_operand.vmem [shape: f32[2,16,1], index: 7, kind: input, shape index: {}]   ;;  %s2794_s8 = inlined_call_operand.vmem [shape: f32[2,16,1], index: 8, kind: input, shape index: {}]   ;;  %s2795_s9 = inlined_call_operand.vmem [shape: f32[2,32,1], index: 9, kind: input, shape index: {}]   ;;  %s2796_s10 = inlined_call_operand.vmem [shape: f32[2,32,1], index: 10, kind: input, shape index: {}]   ;;  %s2797_s11 = inlined_call_operand.vmem [shape: f32[32,512], index: 11, kind: output, shape index: {}]  }
   0x1   :  { %s26_s18 = sshll.u32 %s2078_s17, 4  ;;  %s27_s18 = int_to_ptr.vmem [resolvable:$true] %s26_s18 }
   0x2   :  { %s2064_s19 = scalar_lea.vmem %s27_s18, 24576  ;;  %p2069_p1 = scmp.lt.s32.totalorder %s27_s18, %s27_s18 }
   0x3   :  { %p2065_p0 = scmp.ne.s32.totalorder %s27_s18, %s2064_s19  ;;  %p2070_p2 = scmp.lt.s32.totalorder %s2064_s19, %s2064_s19 }
   0x5   :  { %p2071_p3 = por %p2070_p2, %p2069_p1 }
   0x7   :  { %p2072_p4 = pnand %p2071_p3, %p2065_p0 }
   0x9   :  { %2075 = shalt.err (!%p2072_p4)
}
   0xa   :  { %s2079_s20 = smov 768   ;;  %s2080_s21 = smov 48  }
   0xb   :  { %32 = dma.hbm_to_vmem [thread:$0]  %s2788_s2, 24576, %s27_s18, [#allocation3], %s2079_s20, %s2079_s20, %s2080_s21  }
   0xc   :  { %2076 = dma.done.wait [#allocation3], 24576  }
   0xd   :  { %2077 = vsyncadd [#allocation3], 4294942720  ;;  %v2081_v0 = vmov 0.0   ;;  %v53_v1 = vld [vmem:[%s2786_s0 + $0x8] sm:$0xff]  ;;  %v52_v2 = vld [vmem:[%s2786_s0] sm:$0xff]  ;;  %vm58_vm0 = vcmask 64512  }
   0xe   :  { %129 = vmatprep.mubr.f32.mxu0 %v2081_v0  ;;  %206 = vmatprep.mubr.f32.mxu1 %v2081_v0  ;;  %v56_v3 = vld [vmem:[%s2787_s1] sm:$0xff]  ;;  %v55_v4 = vld [vmem:[%s2786_s0 + $0x18] sm:$0xff]  ;;  %v54_v5 = vld [vmem:[%s2786_s0 + $0x10] sm:$0xff]  ;;  %v2082_v47 = vmov 0   ;;  %vm777_vm1 = vcmask 392192   ;;  %vm938_vm2 = vcmask 130048  }
   0xf   :  { %95 = vmatprep.subr.mxu0 %v53_v1  ;;  %172 = vmatprep.subr.mxu1 %v55_v4  ;;  %v57_v6 = vld [vmem:[%s2787_s1 + $0x8] sm:$0xff]  ;;  %v1985_v48 = vld [vmem:[%s2793_s7 + $0x10] sm:$0xff]  ;;  %v405_v49 = vld [vmem:[#allocation2 + $0x2d8] sm:$0xff] }
  0x10   :  { %96 = vmatpush1.msra.mxu0 %v52_v2  ;;  %173 = vmatpush1.msra.mxu1 %v54_v5  ;;  %v404_v50 = vld [vmem:[#allocation2 + $0x2d0] sm:$0xff]  ;;  %v407_v51 = vld [vmem:[#allocation2 + $0x2e8] sm:$0xff]  ;;  %v406_v53 = vld [vmem:[#allocation2 + $0x2e0] sm:$0xff] }
  0x11   :  { %1981 = vmatmul.mubr.msk.f32.vlgmr.msra.gmra.mxu0 %vm58_vm0, %v56_v3  ;;  %1983 = vmatmul.mubr.msk.f32.vlgmr.msra.gmra.mxu1 %vm58_vm0, %v56_v3  ;;  %v399_v52 = vld [vmem:[#allocation2 + $0x2a8] sm:$0xff]  ;;  %v398_v54 = vld [vmem:[#allocation2 + $0x2a0] sm:$0xff]  ;;  %v401_v55 = vld [vmem:[#allocation2 + $0x2b8] sm:$0xff] }
  0x12   :  { %135 = vmatprep.mubr.f32.mxu0 %v2081_v0  ;;  %212 = vmatprep.mubr.f32.mxu1 %v2081_v0  ;;  %v393_v56 = vld [vmem:[#allocation2 + $0x278] sm:$0xff]  ;;  %v400_v57 = vld [vmem:[#allocation2 + $0x2b0] sm:$0xff]  ;;  %v395_v59 = vld [vmem:[#allocation2 + $0x288] sm:$0xff] }
  0x13   :  { %2027 = vset.pattern.permute.xlu1 %v2082_v47  ;;  %2026 = vset.pattern.permute.xlu0 %v2082_v47  ;;  %v392_v58 = vld [vmem:[#allocation2 + $0x270] sm:$0xff]  ;;  %v387_v60 = vld [vmem:[#allocation2 + $0x248] sm:$0xff]  ;;  %v394_v61 = vld [vmem:[#allocation2 + $0x280] sm:$0xff] }
  0x14   :  { %506 = vmatprep.subr.mxu0 %v405_v49  ;;  %595 = vmatprep.subr.mxu1 %v407_v51  ;;  %v389_v62 = vld [vmem:[#allocation2 + $0x258] sm:$0xff]  ;;  %v386_v63 = vld [vmem:[#allocation2 + $0x240] sm:$0xff]  ;;  %v388_v1 = vld [vmem:[#allocation2 + $0x250] sm:$0xff] }
  0x15   :  { %1982 = vmatmul.mubr.msk.f32.gmra.mxu0 %vm58_vm0, %v57_v6  ;;  %1984 = vmatmul.mubr.msk.f32.gmra.mxu1 %vm58_vm0, %v57_v6  ;;  %v381_v2 = vld [vmem:[#allocation2 + $0x218] sm:$0xff]  ;;  %v383_v3 = vld [vmem:[#allocation2 + $0x228] sm:$0xff]  ;;  %v380_v4 = vld [vmem:[#allocation2 + $0x210] sm:$0xff] }
  0x16   :  { %507 = vmatpush1.msra.mxu0 %v404_v50  ;;  %596 = vmatpush1.msra.mxu1 %v406_v53  ;;  %v382_v5 = vld [vmem:[#allocation2 + $0x220] sm:$0xff]  ;;  %v375_v6 = vld [vmem:[#allocation2 + $0x1e8] sm:$0xff]  ;;  %v329_v47 = vld [vmem:[#allocation2 + $0x78] sm:$0xff] }
  0x17   :  { %508 = vmatprep.subr.mxu0 %v399_v52  ;;  %597 = vmatprep.subr.mxu1 %v401_v55  ;;  %v328_v49 = vld [vmem:[#allocation2 + $0x70] sm:$0xff]  ;;  %v321_v50 = vld [vmem:[#allocation2 + $0x38] sm:$0xff]  ;;  %v323_v51 = vld [vmem:[#allocation2 + $0x48] sm:$0xff] }
  0x18   :  { %509 = vmatpush1.msra.mxu0 %v398_v54  ;;  %598 = vmatpush1.msra.mxu1 %v400_v57  ;;  %v320_v52 = vld [vmem:[#allocation2 + $0x30] sm:$0xff]  ;;  %v322_v53 = vld [vmem:[#allocation2 + $0x40] sm:$0xff]  ;;  %v315_v54 = vld [vmem:[#allocation2 + $0x8] sm:$0xff] }
  0x19   :  { %510 = vmatprep.subr.mxu0 %v393_v56  ;;  %599 = vmatprep.subr.mxu1 %v395_v59  ;;  %v317_v55 = vld [vmem:[#allocation2 + $0x18] sm:$0xff]  ;;  %v314_v56 = vld [vmem:[#allocation2] sm:$0xff]  ;;  %v316_v57 = vld [vmem:[#allocation2 + $0x10] sm:$0xff] }
  0x1a   :  { %511 = vmatpush1.msra.mxu0 %v392_v58  ;;  %600 = vmatpush1.msra.mxu1 %v394_v61  ;;  %v501_v58 = vld [vmem:[#allocation2 + $0x5d8] sm:$0xff]  ;;  %v503_v59 = vld [vmem:[#allocation2 + $0x5e8] sm:$0xff]  ;;  %v502_v61 = vld [vmem:[#allocation2 + $0x5e0] sm:$0xff] }
  0x1b   :  { %512 = vmatprep.subr.mxu0 %v387_v60  ;;  %601 = vmatprep.subr.mxu1 %v389_v62  ;;  %v500_v60 = vld [vmem:[#allocation2 + $0x5d0] sm:$0xff]  ;;  %v495_v62 = vld [vmem:[#allocation2 + $0x5a8] sm:$0xff] }
  0x1c   :  { %513 = vmatpush1.msra.mxu0 %v386_v63  ;;  %602 = vmatpush1.msra.mxu1 %v388_v1  ;;  %v497_v63 = vld [vmem:[#allocation2 + $0x5b8] sm:$0xff]  ;;  %v494_v1 = vld [vmem:[#allocation2 + $0x5a0] sm:$0xff] }
  0x1d   :  { %514 = vmatprep.subr.mxu0 %v381_v2  ;;  %603 = vmatprep.subr.mxu1 %v383_v3  ;;  %v496_v2 = vld [vmem:[#allocation2 + $0x5b0] sm:$0xff]  ;;  %v489_v3 = vld [vmem:[#allocation2 + $0x578] sm:$0xff] }
  0x1e   :  { %515 = vmatpush1.msra.mxu0 %v380_v4  ;;  %604 = vmatpush1.msra.mxu1 %v382_v5  ;;  %v491_v4 = vld [vmem:[#allocation2 + $0x588] sm:$0xff]  ;;  %v488_v5 = vld [vmem:[#allocation2 + $0x570] sm:$0xff] }
  0x1f   :  { %516 = vmatprep.subr.mxu0 %v375_v6  ;;  %v490_v6 = vld [vmem:[#allocation2 + $0x580] sm:$0xff] }
  0xd1   :  { %v131_v7 = vpop.f32.mrf.mxu0  ;;  %v208_v8 = vpop.f32.mrf.mxu1 }
  0xd3   :  { %v133_v9 = vpop.f32.mrf.mxu0  ;;  %v210_v11 = vpop.f32.mrf.mxu1 }
  0xd4   :  { %v224_v10 = vadd.f32 %v133_v9, %v131_v7 }
  0xd5   :  { %v137_v12 = vpop.f32.mrf.mxu0  ;;  %v214_v14 = vpop.f32.mrf.mxu1 }
  0xd6   :  { %v225_v13 = vadd.f32 %v224_v10, %v208_v8  ;;  %v369_v10 = vld [vmem:[#allocation2 + $0x1b8] sm:$0xff] }
  0xd7   :  { %v139_v15 = vpop.f32.mrf.mxu0  ;;  %v216_v18 = vpop.f32.mrf.mxu1 }
  0xd8   :  { %v229_v16 = vadd.f32 %v139_v15, %v137_v12  ;;  %v226_v17 = vadd.f32 %v225_v13, %v210_v11  ;;  %v370_v13 = vld [vmem:[#allocation2 + $0x1c0] sm:$0xff] }
  0xda   :  { %v230_v19 = vadd.f32 %v229_v16, %v214_v14  ;;  %227 = vadd.xlane.f32.xlu0 %v226_v17  ;;  %v362_v16 = vld [vmem:[#allocation2 + $0x180] sm:$0xff]  ;;  %v364_v17 = vld [vmem:[#allocation2 + $0x190] sm:$0xff] }
  0xdc   :  { %v231_v20 = vadd.f32 %v230_v19, %v216_v18  ;;  %v359_v19 = vld [vmem:[#allocation2 + $0x168] sm:$0xff] }
  0xde   :  { %232 = vadd.xlane.f32.xlu0 %v231_v20  ;;  %v356_v20 = vld [vmem:[#allocation2 + $0x150] sm:$0xff] }
 0x163   :  { %v228_v21 = vpop.xlane.xlu0 %227 }
 0x164   :  { %v234_v22 = vmul.f32 0.001953125, %v228_v21  ;;  %v358_v21 = vld [vmem:[#allocation2 + $0x160] sm:$0xff] }
 0x166   :  { %v2172_v23 = vsub.f32 %v131_v7, %v234_v22  ;;  %v2174_v24 = vsub.f32 %v133_v9, %v234_v22  ;;  %v2176_v25 = vsub.f32 %v208_v8, %v234_v22  ;;  %v2178_v27 = vsub.f32 %v210_v11, %v234_v22  ;;  %v377_v7 = vld [vmem:[#allocation2 + $0x1f8] sm:$0xff]  ;;  %v374_v8 = vld [vmem:[#allocation2 + $0x1e0] sm:$0xff]  ;;  %v376_v9 = vld [vmem:[#allocation2 + $0x1f0] sm:$0xff] }
 0x167   :  { %v233_v26 = vpop.xlane.xlu0 %232  ;;  %v371_v11 = vld [vmem:[#allocation2 + $0x1c8] sm:$0xff]  ;;  %605 = vmatprep.subr.mxu1 %v377_v7  ;;  %517 = vmatpush1.msra.mxu0 %v374_v8  ;;  %v485_v8 = vld [vmem:[#allocation2 + $0x558] sm:$0xff] }
 0x168   :  { %v235_v28 = vmul.f32 0.001953125, %v233_v26  ;;  %v244_v29 = vmul.f32 %v2172_v23, %v2172_v23  ;;  %v245_v30 = vmul.f32 %v2174_v24, %v2174_v24  ;;  %v246_v31 = vmul.f32 %v2176_v25, %v2176_v25  ;;  %606 = vmatpush1.msra.mxu1 %v376_v9  ;;  %518 = vmatprep.subr.mxu0 %v369_v10  ;;  %v351_v22 = vld [vmem:[#allocation2 + $0x128] sm:$0xff]  ;;  %v353_v26 = vld [vmem:[#allocation2 + $0x138] sm:$0xff]  ;;  %v482_v9 = vld [vmem:[#allocation2 + $0x540] sm:$0xff] }
 0x169   :  { %v247_v36 = vmul.f32 %v2178_v27, %v2178_v27  ;;  %607 = vmatprep.subr.mxu1 %v371_v11  ;;  %v483_v7 = vld [vmem:[#allocation2 + $0x548] sm:$0xff]  ;;  %v484_v10 = vld [vmem:[#allocation2 + $0x550] sm:$0xff]  ;;  %v477_v11 = vld [vmem:[#allocation2 + $0x518] sm:$0xff] }
 0x16a   :  { %v2186_v32 = vsub.f32 %v137_v12, %v235_v28  ;;  %v2188_v33 = vsub.f32 %v139_v15, %v235_v28  ;;  %v252_v34 = vadd.f32 %v245_v30, %v244_v29  ;;  %v2190_v35 = vsub.f32 %v214_v14, %v235_v28  ;;  %v368_v12 = vld [vmem:[#allocation2 + $0x1b0] sm:$0xff]  ;;  %v363_v14 = vld [vmem:[#allocation2 + $0x188] sm:$0xff]  ;;  %v365_v15 = vld [vmem:[#allocation2 + $0x198] sm:$0xff]  ;;  %608 = vmatpush1.msra.mxu1 %v370_v13 }
 0x16b   :  { %v2194_v38 = vsub.f32 %v216_v18, %v235_v28  ;;  %519 = vmatpush1.msra.mxu0 %v368_v12  ;;  %v357_v18 = vld [vmem:[#allocation2 + $0x158] sm:$0xff]  ;;  %609 = vmatprep.subr.mxu1 %v365_v15  ;;  %v350_v28 = vld [vmem:[#allocation2 + $0x120] sm:$0xff]  ;;  %v352_v29 = vld [vmem:[#allocation2 + $0x130] sm:$0xff] }
 0x16c   :  { %v253_v37 = vadd.f32 %v252_v34, %v246_v31  ;;  %v248_v39 = vmul.f32 %v2186_v32, %v2186_v32  ;;  %v249_v40 = vmul.f32 %v2188_v33, %v2188_v33  ;;  %v250_v42 = vmul.f32 %v2190_v35, %v2190_v35  ;;  %520 = vmatprep.subr.mxu0 %v363_v14  ;;  %v345_v30 = vld [vmem:[#allocation2 + $0xf8] sm:$0xff]  ;;  %v347_v31 = vld [vmem:[#allocation2 + $0x108] sm:$0xff]  ;;  %v344_v34 = vld [vmem:[#allocation2 + $0xf0] sm:$0xff] }
 0x16d   :  { %v251_v44 = vmul.f32 %v2194_v38, %v2194_v38  ;;  %521 = vmatpush1.msra.mxu0 %v362_v16  ;;  %610 = vmatpush1.msra.mxu1 %v364_v17  ;;  %v479_v12 = vld [vmem:[#allocation2 + $0x528] sm:$0xff]  ;;  %v476_v13 = vld [vmem:[#allocation2 + $0x510] sm:$0xff]  ;;  %v478_v14 = vld [vmem:[#allocation2 + $0x520] sm:$0xff] }
 0x16e   :  { %v254_v41 = vadd.f32 %v253_v37, %v247_v36  ;;  %v257_v43 = vadd.f32 %v249_v40, %v248_v39  ;;  %522 = vmatprep.subr.mxu0 %v357_v18  ;;  %611 = vmatprep.subr.mxu1 %v359_v19  ;;  %v346_v36 = vld [vmem:[#allocation2 + $0x100] sm:$0xff]  ;;  %v339_v37 = vld [vmem:[#allocation2 + $0xc8] sm:$0xff]  ;;  %v341_v39 = vld [vmem:[#allocation2 + $0xd8] sm:$0xff] }
 0x16f   :  { %523 = vmatpush1.msra.mxu0 %v356_v20  ;;  %612 = vmatpush1.msra.mxu1 %v358_v21  ;;  %v338_v40 = vld [vmem:[#allocation2 + $0xc0] sm:$0xff]  ;;  %v471_v15 = vld [vmem:[#allocation2 + $0x4e8] sm:$0xff]  ;;  %v473_v16 = vld [vmem:[#allocation2 + $0x4f8] sm:$0xff] }
 0x170   :  { %255 = vadd.xlane.f32.xlu1 %v254_v41  ;;  %v258_v45 = vadd.f32 %v257_v43, %v250_v42  ;;  %524 = vmatprep.subr.mxu0 %v351_v22  ;;  %v340_v41 = vld [vmem:[#allocation2 + $0xd0] sm:$0xff]  ;;  %v333_v42 = vld [vmem:[#allocation2 + $0x98] sm:$0xff]  ;;  %v335_v43 = vld [vmem:[#allocation2 + $0xa8] sm:$0xff] }
 0x171   :  { %613 = vmatprep.subr.mxu1 %v353_v26  ;;  %525 = vmatpush1.msra.mxu0 %v350_v28  ;;  %v470_v17 = vld [vmem:[#allocation2 + $0x4e0] sm:$0xff]  ;;  %v472_v18 = vld [vmem:[#allocation2 + $0x4f0] sm:$0xff]  ;;  %v465_v19 = vld [vmem:[#allocation2 + $0x4b8] sm:$0xff] }
 0x172   :  { %v259_v46 = vadd.f32 %v258_v45, %v251_v44  ;;  %614 = vmatpush1.msra.mxu1 %v352_v29  ;;  %526 = vmatprep.subr.mxu0 %v345_v30  ;;  %v332_v44 = vld [vmem:[#allocation2 + $0x90] sm:$0xff]  ;;  %v334_v45 = vld [vmem:[#allocation2 + $0xa0] sm:$0xff]  ;;  %v467_v20 = vld [vmem:[#allocation2 + $0x4c8] sm:$0xff] }
 0x173   :  { %615 = vmatprep.subr.mxu1 %v347_v31  ;;  %527 = vmatpush1.msra.mxu0 %v344_v34  ;;  %v464_v21 = vld [vmem:[#allocation2 + $0x4b0] sm:$0xff]  ;;  %v466_v22 = vld [vmem:[#allocation2 + $0x4c0] sm:$0xff]  ;;  %v459_v26 = vld [vmem:[#allocation2 + $0x488] sm:$0xff] }
 0x174   :  { %260 = vadd.xlane.f32.xlu1 %v259_v46  ;;  %616 = vmatpush1.msra.mxu1 %v346_v36  ;;  %v327_v46 = vld [vmem:[#allocation2 + $0x68] sm:$0xff]  ;;  %v461_v28 = vld [vmem:[#allocation2 + $0x498] sm:$0xff]  ;;  %v458_v29 = vld [vmem:[#allocation2 + $0x480] sm:$0xff] }
 0x175   :  { %528 = vmatprep.subr.mxu0 %v339_v37  ;;  %617 = vmatprep.subr.mxu1 %v341_v39  ;;  %v460_v30 = vld [vmem:[#allocation2 + $0x490] sm:$0xff]  ;;  %v453_v31 = vld [vmem:[#allocation2 + $0x458] sm:$0xff]  ;;  %v455_v34 = vld [vmem:[#allocation2 + $0x468] sm:$0xff] }
 0x176   :  { %529 = vmatpush1.msra.mxu0 %v338_v40  ;;  %618 = vmatpush1.msra.mxu1 %v340_v41  ;;  %v452_v36 = vld [vmem:[#allocation2 + $0x450] sm:$0xff]  ;;  %v454_v37 = vld [vmem:[#allocation2 + $0x460] sm:$0xff]  ;;  %v447_v39 = vld [vmem:[#allocation2 + $0x428] sm:$0xff] }
 0x177   :  { %530 = vmatprep.subr.mxu0 %v333_v42  ;;  %619 = vmatprep.subr.mxu1 %v335_v43  ;;  %v449_v40 = vld [vmem:[#allocation2 + $0x438] sm:$0xff]  ;;  %v446_v41 = vld [vmem:[#allocation2 + $0x420] sm:$0xff]  ;;  %v448_v42 = vld [vmem:[#allocation2 + $0x430] sm:$0xff] }
 0x178   :  { %531 = vmatpush1.msra.mxu0 %v332_v44  ;;  %620 = vmatpush1.msra.mxu1 %v334_v45  ;;  %v441_v43 = vld [vmem:[#allocation2 + $0x3f8] sm:$0xff]  ;;  %v443_v44 = vld [vmem:[#allocation2 + $0x408] sm:$0xff]  ;;  %v440_v45 = vld [vmem:[#allocation2 + $0x3f0] sm:$0xff] }
 0x179   :  { %532 = vmatprep.subr.mxu0 %v327_v46  ;;  %621 = vmatprep.subr.mxu1 %v329_v47  ;;  %v442_v46 = vld [vmem:[#allocation2 + $0x400] sm:$0xff]  ;;  %v435_v47 = vld [vmem:[#allocation2 + $0x3c8] sm:$0xff] }
 0x17a   :  { %622 = vmatpush1.msra.mxu1 %v328_v49  ;;  %v434_v49 = vld [vmem:[#allocation2 + $0x3c0] sm:$0xff] }
 0x17b   :  { %623 = vmatprep.subr.mxu1 %v323_v51  ;;  %v429_v51 = vld [vmem:[#allocation2 + $0x398] sm:$0xff] }
 0x17c   :  { %624 = vmatpush1.msra.mxu1 %v322_v53  ;;  %v428_v53 = vld [vmem:[#allocation2 + $0x390] sm:$0xff] }
 0x17d   :  { %625 = vmatprep.subr.mxu1 %v317_v55 }
 0x17e   :  { %626 = vmatpush1.msra.mxu1 %v316_v57 }
 0x17f   :  { %627 = vmatprep.subr.mxu1 %v503_v59 }
 0x180   :  { %628 = vmatpush2.msra.mxu1 %v502_v61  ;;  %v423_v61 = vld [vmem:[#allocation2 + $0x368] sm:$0xff] }
 0x181   :  { %629 = vmatprep.subr.mxu1 %v497_v63 }
 0x182   :  { %630 = vmatpush2.msra.mxu1 %v496_v2  ;;  %v425_v2 = vld [vmem:[#allocation2 + $0x378] sm:$0xff] }
 0x183   :  { %631 = vmatprep.subr.mxu1 %v491_v4  ;;  %v417_v4 = vld [vmem:[#allocation2 + $0x338] sm:$0xff] }
 0x184   :  { %632 = vmatpush2.msra.mxu1 %v490_v6  ;;  %v220_v6 = vld [vmem:[%s2793_s7 + $0x8] sm:$0xff] }
 0x185   :  { %290 = vperm.xlu1 %2027, %v1985_v48   ;;  %v326_v48 = vld [vmem:[#allocation2 + $0x60] sm:$0xff]  ;;  %633 = vmatprep.subr.mxu1 %v485_v8  ;;  %v419_v8 = vld [vmem:[#allocation2 + $0x348] sm:$0xff] }
 0x186   :  { %533 = vmatpush1.msra.mxu0 %v326_v48  ;;  %634 = vmatpush2.msra.mxu1 %v484_v10  ;;  %v437_v48 = vld [vmem:[#allocation2 + $0x3d8] sm:$0xff]  ;;  %v418_v10 = vld [vmem:[#allocation2 + $0x340] sm:$0xff] }
 0x187   :  { %534 = vmatprep.subr.mxu0 %v321_v50  ;;  %635 = vmatprep.subr.mxu1 %v479_v12  ;;  %v436_v50 = vld [vmem:[#allocation2 + $0x3d0] sm:$0xff]  ;;  %v410_v12 = vld [vmem:[#allocation2 + $0x300] sm:$0xff] }
 0x188   :  { %535 = vmatpush1.msra.mxu0 %v320_v52  ;;  %636 = vmatpush2.msra.mxu1 %v478_v14  ;;  %v431_v52 = vld [vmem:[#allocation2 + $0x3a8] sm:$0xff] }
 0x189   :  { %536 = vmatprep.subr.mxu0 %v315_v54  ;;  %637 = vmatprep.subr.mxu1 %v473_v16  ;;  %v409_v16 = vld [vmem:[#allocation2 + $0x2f8] sm:$0xff] }
 0x18a   :  { %537 = vmatpush1.msra.mxu0 %v314_v56  ;;  %638 = vmatpush2.msra.mxu1 %v472_v18 }
 0x18b   :  { %538 = vmatprep.subr.mxu0 %v501_v58  ;;  %639 = vmatprep.subr.mxu1 %v467_v20 }
 0x18c   :  { %539 = vmatpush2.msra.mxu0 %v500_v60  ;;  %640 = vmatpush2.msra.mxu1 %v466_v22  ;;  %v219_v60 = vld [vmem:[%s2793_s7] sm:$0xff] }
 0x18d   :  { %540 = vmatprep.subr.mxu0 %v495_v62  ;;  %641 = vmatprep.subr.mxu1 %v461_v28  ;;  %v430_v62 = vld [vmem:[#allocation2 + $0x3a0] sm:$0xff] }
 0x18e   :  { %541 = vmatpush2.msra.mxu0 %v494_v1  ;;  %642 = vmatpush2.msra.mxu1 %v460_v30  ;;  %v422_v1 = vld [vmem:[#allocation2 + $0x360] sm:$0xff] }
 0x18f   :  { %542 = vmatprep.subr.mxu0 %v489_v3  ;;  %643 = vmatprep.subr.mxu1 %v455_v34 }
 0x190   :  { %543 = vmatpush2.msra.mxu0 %v488_v5  ;;  %644 = vmatpush2.msra.mxu1 %v454_v37  ;;  %v424_v5 = vld [vmem:[#allocation2 + $0x370] sm:$0xff] }
 0x191   :  { %544 = vmatprep.subr.mxu0 %v483_v7  ;;  %645 = vmatprep.subr.mxu1 %v449_v40  ;;  %v416_v7 = vld [vmem:[#allocation2 + $0x330] sm:$0xff] }
 0x192   :  { %545 = vmatpush2.msra.mxu0 %v482_v9  ;;  %646 = vmatpush2.msra.mxu1 %v448_v42  ;;  %v411_v9 = vld [vmem:[#allocation2 + $0x308] sm:$0xff]  ;;  %v408_v37 = vld [vmem:[#allocation2 + $0x2f0] sm:$0xff] }
 0x193   :  { %546 = vmatprep.subr.mxu0 %v477_v11  ;;  %647 = vmatprep.subr.mxu1 %v443_v44  ;;  %v396_v44 = vld [vmem:[#allocation2 + $0x290] sm:$0xff] }
 0x194   :  { %547 = vmatpush2.msra.mxu0 %v476_v13  ;;  %648 = vmatpush2.msra.mxu1 %v442_v46  ;;  %v413_v13 = vld [vmem:[#allocation2 + $0x318] sm:$0xff]  ;;  %v390_v46 = vld [vmem:[#allocation2 + $0x260] sm:$0xff] }
 0x195   :  { %548 = vmatprep.subr.mxu0 %v471_v15  ;;  %649 = vmatprep.subr.mxu1 %v437_v48  ;;  %v412_v15 = vld [vmem:[#allocation2 + $0x310] sm:$0xff] }
 0x196   :  { %549 = vmatpush2.msra.mxu0 %v470_v17  ;;  %650 = vmatpush2.msra.mxu1 %v436_v50  ;;  %v1986_v17 = vld [vmem:[%s2793_s7 + $0x18] sm:$0xff] }
 0x197   :  { %550 = vmatprep.subr.mxu0 %v465_v19  ;;  %651 = vmatprep.subr.mxu1 %v431_v52 }
 0x198   :  { %551 = vmatpush2.msra.mxu0 %v464_v21  ;;  %652 = vmatpush2.msra.mxu1 %v430_v62  ;;  %v360_v62 = vld [vmem:[#allocation2 + $0x170] sm:$0xff] }
 0x199   :  { %552 = vmatprep.subr.mxu0 %v459_v26  ;;  %653 = vmatprep.subr.mxu1 %v425_v2  ;;  %v349_v2 = vld [vmem:[#allocation2 + $0x118] sm:$0xff] }
 0x19a   :  { %553 = vmatpush2.msra.mxu0 %v458_v29  ;;  %654 = vmatpush2.msra.mxu1 %v424_v5  ;;  %v342_v5 = vld [vmem:[#allocation2 + $0xe0] sm:$0xff] }
 0x19b   :  { %554 = vmatprep.subr.mxu0 %v453_v31  ;;  %655 = vmatprep.subr.mxu1 %v419_v8  ;;  %v331_v8 = vld [vmem:[#allocation2 + $0x88] sm:$0xff] }
 0x19c   :  { %555 = vmatpush2.msra.mxu0 %v452_v36  ;;  %656 = vmatpush2.msra.mxu1 %v418_v10  ;;  %v325_v10 = vld [vmem:[#allocation2 + $0x58] sm:$0xff] }
 0x19d   :  { %556 = vmatprep.subr.mxu0 %v447_v39  ;;  %657 = vmatprep.subr.mxu1 %v413_v13  ;;  %v318_v13 = vld [vmem:[#allocation2 + $0x20] sm:$0xff] }
 0x19e   :  { %557 = vmatpush2.msra.mxu0 %v446_v41  ;;  %658 = vmatpush2.msra.mxu1 %v412_v15  ;;  %v402_v41 = vld [vmem:[#allocation2 + $0x2c0] sm:$0xff]  ;;  %v504_v15 = vld [vmem:[#allocation2 + $0x5f0] sm:$0xff] }
 0x19f   :  { %558 = vmatprep.subr.mxu0 %v441_v43 }
 0x1a0   :  { %559 = vmatpush2.msra.mxu0 %v440_v45  ;;  %v391_v45 = vld [vmem:[#allocation2 + $0x268] sm:$0xff] }
 0x1a1   :  { %560 = vmatprep.subr.mxu0 %v435_v47 }
 0x1a2   :  { %561 = vmatpush2.msra.mxu0 %v434_v49  ;;  %v385_v49 = vld [vmem:[#allocation2 + $0x238] sm:$0xff] }
 0x1a3   :  { %562 = vmatprep.subr.mxu0 %v429_v51  ;;  %v384_v51 = vld [vmem:[#allocation2 + $0x230] sm:$0xff] }
 0x1a4   :  { %563 = vmatpush2.msra.mxu0 %v428_v53 }
 0x1a5   :  { %564 = vmatprep.subr.mxu0 %v423_v61  ;;  %v361_v61 = vld [vmem:[#allocation2 + $0x178] sm:$0xff] }
 0x1a6   :  { %565 = vmatpush2.msra.mxu0 %v422_v1  ;;  %v354_v1 = vld [vmem:[#allocation2 + $0x140] sm:$0xff] }
 0x1a7   :  { %566 = vmatprep.subr.mxu0 %v417_v4  ;;  %v343_v4 = vld [vmem:[#allocation2 + $0xe8] sm:$0xff] }
 0x1a8   :  { %567 = vmatpush2.msra.mxu0 %v416_v7  ;;  %v336_v7 = vld [vmem:[#allocation2 + $0xb0] sm:$0xff] }
 0x1a9   :  { %568 = vmatprep.subr.mxu0 %v411_v9  ;;  %v330_v9 = vld [vmem:[#allocation2 + $0x80] sm:$0xff] }
 0x1aa   :  { %569 = vmatpush2.msra.mxu0 %v410_v12  ;;  %v319_v12 = vld [vmem:[#allocation2 + $0x28] sm:$0xff] }
 0x1ab   :  { %684 = vmatprep.subr.mxu0 %v409_v16  ;;  %v499_v16 = vld [vmem:[#allocation2 + $0x5c8] sm:$0xff] }
 0x1f9   :  { %v256_v54 = vpop.xlane.xlu1 %255 }
 0x1fa   :  { %v262_v55 = vmul.f32 0.001953125, %v256_v54  ;;  %v378_v54 = vld [vmem:[#allocation2 + $0x200] sm:$0xff] }
 0x1fc   :  { %v264_v56 = vadd.f32 1e-05, %v262_v55 }
 0x1fd   :  { %v261_v57 = vpop.xlane.xlu1 %260 }
 0x1fe   :  { %2028 = vrsqrt.f32 %v264_v56  ;;  %v263_v58 = vmul.f32 0.001953125, %v261_v57  ;;  %v373_v57 = vld [vmem:[#allocation2 + $0x1d8] sm:$0xff] }
 0x200   :  { %v265_v59 = vadd.f32 1e-05, %v263_v58  ;;  %v367_v58 = vld [vmem:[#allocation2 + $0x1a8] sm:$0xff] }
 0x201   :  { %v291_v18 = vpop.permute.xlu1 %290 }
 0x202   :  { %2030 = vrsqrt.f32 %v265_v59 }
 0x20b   :  { %v2029_v63 = vpop.eup %2028 }
 0x20c   :  { %v268_v3 = vmul.f32 %v2029_v63, %v219_v60  ;;  %v366_v60 = vld [vmem:[#allocation2 + $0x1a0] sm:$0xff]  ;;  %v355_v63 = vld [vmem:[#allocation2 + $0x148] sm:$0xff] }
 0x20e   :  { %272 = vperm.xlu0 %2026, %v268_v3   ;;  %v348_v3 = vld [vmem:[#allocation2 + $0x110] sm:$0xff] }
 0x20f   :  { %v2031_v11 = vpop.eup %2030 }
 0x210   :  { %v269_v14 = vmul.f32 %v2031_v11, %v220_v6  ;;  %v337_v6 = vld [vmem:[#allocation2 + $0xb8] sm:$0xff]  ;;  %v324_v11 = vld [vmem:[#allocation2 + $0x50] sm:$0xff] }
 0x212   :  { %277 = vperm.xlu1 %2027, %v269_v14   ;;  %v505_v14 = vld [vmem:[#allocation2 + $0x5f8] sm:$0xff] }
 0x216   :  { %295 = vperm.xlu1 %2027, %v1986_v17   ;;  %v498_v17 = vld [vmem:[#allocation2 + $0x5c0] sm:$0xff] }
 0x289   :  { %v273_v19 = vpop.permute.xlu0 %272 }
 0x28a   :  { %v280_v20 = vmul.f32 %v273_v19, %v2172_v23  ;;  %v281_v21 = vmul.f32 %v273_v19, %v2174_v24  ;;  %v283_v31 = vmul.f32 %v273_v19, %v2178_v27  ;;  %v403_v24 = vld [vmem:[#allocation2 + $0x2c8] sm:$0xff]  ;;  %v282_v42 = vmul.f32 %v273_v19, %v2176_v25  ;;  %v397_v27 = vld [vmem:[#allocation2 + $0x298] sm:$0xff]  ;;  %v492_v19 = vld [vmem:[#allocation2 + $0x590] sm:$0xff] }
 0x28c   :  { %v298_v22 = vadd.f32 %v291_v18, %v280_v20  ;;  %v299_v26 = vadd.f32 %v291_v18, %v281_v21  ;;  %v300_v47 = vadd.f32 %v291_v18, %v282_v42  ;;  %v487_v20 = vld [vmem:[#allocation2 + $0x568] sm:$0xff]  ;;  %v486_v21 = vld [vmem:[#allocation2 + $0x560] sm:$0xff]  ;;  %v445_v42 = vld [vmem:[#allocation2 + $0x418] sm:$0xff] }
 0x28d   :  { %v278_v28 = vpop.permute.xlu1 %277 }
 0x28e   :  { %v2218_v29 = vmax.f32 %v298_v22, 0.0  ;;  %v2220_v30 = vmax.f32 %v299_v26, 0.0  ;;  %v284_v34 = vmul.f32 %v278_v28, %v2186_v32  ;;  %v285_v36 = vmul.f32 %v278_v28, %v2188_v33  ;;  %v481_v22 = vld [vmem:[#allocation2 + $0x538] sm:$0xff]  ;;  %v480_v26 = vld [vmem:[#allocation2 + $0x530] sm:$0xff] }
 0x28f   :  { %v301_v32 = vadd.f32 %v291_v18, %v283_v31  ;;  %v287_v25 = vmul.f32 %v278_v28, %v2194_v38  ;;  %v286_v52 = vmul.f32 %v278_v28, %v2190_v35  ;;  %v379_v38 = vld [vmem:[#allocation2 + $0x208] sm:$0xff]  ;;  %v2244_v53 = vmax.f32 %v300_v47, 0.0  ;;  %v372_v35 = vld [vmem:[#allocation2 + $0x1d0] sm:$0xff]  ;;  %v493_v18 = vld [vmem:[#allocation2 + $0x598] sm:$0xff] }
 0x290   :  { %570 = vmatprep.mubr.f32.mxu0 %v2220_v30  ;;  %659 = vmatprep.mubr.f32.mxu1 %v2220_v30  ;;  %v475_v28 = vld [vmem:[#allocation2 + $0x508] sm:$0xff]  ;;  %v474_v31 = vld [vmem:[#allocation2 + $0x500] sm:$0xff] }
 0x291   :  { %v296_v23 = vpop.permute.xlu1 %295  ;;  %571 = vmatmul.mubr.f32.vlgmr.msra.gmra.mxu0 %v2218_v29  ;;  %660 = vmatmul.mubr.f32.vlgmr.msra.gmra.mxu1 %v2218_v29  ;;  %v2238_v48 = vmax.f32 %v301_v32, 0.0  ;;  %v439_v32 = vld [vmem:[#allocation2 + $0x3e8] sm:$0xff] }
 0x292   :  { %v302_v39 = vadd.f32 %v296_v23, %v284_v34  ;;  %v303_v40 = vadd.f32 %v296_v23, %v285_v36  ;;  %685 = vmatpush1.msra.mxu0 %v408_v37  ;;  %v305_v50 = vadd.f32 %v296_v23, %v287_v25  ;;  %v304_v55 = vadd.f32 %v296_v23, %v286_v52  ;;  %v469_v34 = vld [vmem:[#allocation2 + $0x4d8] sm:$0xff]  ;;  %v468_v36 = vld [vmem:[#allocation2 + $0x4d0] sm:$0xff]  ;;  %v463_v37 = vld [vmem:[#allocation2 + $0x4a8] sm:$0xff] }
 0x293   :  { %686 = vmatprep.subr.mxu0 %v403_v24  ;;  %v462_v23 = vld [vmem:[#allocation2 + $0x4a0] sm:$0xff]  ;;  %v457_v24 = vld [vmem:[#allocation2 + $0x478] sm:$0xff]  ;;  %v427_v47 = vld [vmem:[#allocation2 + $0x388] sm:$0xff] }
 0x294   :  { %v2230_v33 = vmax.f32 %v302_v39, 0.0  ;;  %v2232_v43 = vmax.f32 %v303_v40, 0.0  ;;  %687 = vmatpush1.msra.mxu0 %v402_v41  ;;  %v2246_v56 = vmax.f32 %v305_v50, 0.0  ;;  %v2252_v59 = vmax.f32 %v304_v55, 0.0  ;;  %v456_v39 = vld [vmem:[#allocation2 + $0x470] sm:$0xff]  ;;  %v451_v40 = vld [vmem:[#allocation2 + $0x448] sm:$0xff] }
 0x295   :  { %688 = vmatprep.subr.mxu0 %v397_v27  ;;  %v450_v41 = vld [vmem:[#allocation2 + $0x440] sm:$0xff]  ;;  %v444_v27 = vld [vmem:[#allocation2 + $0x410] sm:$0xff] }
 0x296   :  { %576 = vmatprep.mubr.f32.mxu0 %v2232_v43  ;;  %689 = vmatpush1.msra.mxu0 %v396_v44  ;;  %v438_v44 = vld [vmem:[#allocation2 + $0x3e0] sm:$0xff]  ;;  %v420_v50 = vld [vmem:[#allocation2 + $0x350] sm:$0xff] }
 0x297   :  { %665 = vmatprep.mubr.f32.mxu1 %v2232_v43  ;;  %690 = vmatprep.subr.mxu0 %v391_v45  ;;  %v433_v45 = vld [vmem:[#allocation2 + $0x3b8] sm:$0xff]  ;;  %v426_v25 = vld [vmem:[#allocation2 + $0x380] sm:$0xff] }
 0x298   :  { %577 = vmatmul.mubr.f32.gmra.mxu0 %v2230_v33  ;;  %666 = vmatmul.mubr.f32.gmra.mxu1 %v2230_v33  ;;  %v414_v52 = vld [vmem:[#allocation2 + $0x320] sm:$0xff] }
 0x299   :  { %691 = vmatpush1.msra.mxu0 %v390_v46  ;;  %582 = vmatprep.mubr.f32.mxu0 %v2238_v48  ;;  %v432_v46 = vld [vmem:[#allocation2 + $0x3b0] sm:$0xff] }
 0x29a   :  { %671 = vmatprep.mubr.f32.mxu1 %v2238_v48  ;;  %692 = vmatprep.subr.mxu0 %v385_v49  ;;  %v421_v49 = vld [vmem:[#allocation2 + $0x358] sm:$0xff] }
 0x29b   :  { %693 = vmatpush1.msra.mxu0 %v384_v51  ;;  %v415_v51 = vld [vmem:[#allocation2 + $0x328] sm:$0xff] }
 0x29c   :  { %694 = vmatprep.subr.mxu0 %v379_v38  ;;  %583 = vmatmul.mubr.f32.gmra.mxu0 %v2244_v53  ;;  %v2052_v38 = vld [vmem:[%s2786_s0 + $0x8] sm:$0xff] }
 0x29d   :  { %672 = vmatmul.mubr.f32.gmra.mxu1 %v2244_v53  ;;  %695 = vmatpush1.msra.mxu0 %v378_v54  ;;  %v2053_v54 = vld [vmem:[%s2786_s0] sm:$0xff] }
 0x29e   :  { %588 = vmatprep.mubr.f32.mxu0 %v2246_v56  ;;  %677 = vmatprep.mubr.f32.mxu1 %v2246_v56 }
 0x29f   :  { %696 = vmatprep.subr.mxu0 %v373_v57 }
 0x2a0   :  { %697 = vmatpush1.msra.mxu0 %v372_v35 }
 0x2a1   :  { %698 = vmatprep.subr.mxu0 %v367_v58  ;;  %589 = vmatmul.mubr.f32.gmra.mxu0 %v2252_v59 }
 0x2a2   :  { %678 = vmatmul.mubr.f32.gmra.mxu1 %v2252_v59  ;;  %699 = vmatpush1.msra.mxu0 %v366_v60 }
 0x2a3   :  { %700 = vmatprep.subr.mxu0 %v361_v61  ;;  %748 = vmatprep.mubr.f32.mxu0 %v2220_v30 }
 0x2a4   :  { %701 = vmatpush1.msra.mxu0 %v360_v62  ;;  %848 = vmatprep.mubr.f32.mxu1 %v2081_v0 }
 0x2a5   :  { %702 = vmatprep.subr.mxu0 %v355_v63 }
 0x2a6   :  { %703 = vmatpush1.msra.mxu0 %v354_v1 }
 0x2a7   :  { %704 = vmatprep.subr.mxu0 %v349_v2 }
 0x2a8   :  { %705 = vmatpush1.msra.mxu0 %v348_v3 }
 0x2a9   :  { %706 = vmatprep.subr.mxu0 %v343_v4 }
 0x2aa   :  { %707 = vmatpush1.msra.mxu0 %v342_v5 }
 0x2ab   :  { %708 = vmatprep.subr.mxu0 %v337_v6 }
 0x2ac   :  { %709 = vmatpush1.msra.mxu0 %v336_v7 }
 0x2ad   :  { %710 = vmatprep.subr.mxu0 %v331_v8 }
 0x2ae   :  { %711 = vmatpush1.msra.mxu0 %v330_v9 }
 0x2af   :  { %712 = vmatprep.subr.mxu0 %v325_v10 }
 0x2b0   :  { %713 = vmatpush1.msra.mxu0 %v324_v11 }
 0x2b1   :  { %714 = vmatprep.subr.mxu0 %v319_v12 }
 0x2b2   :  { %715 = vmatpush1.msra.mxu0 %v318_v13 }
 0x2b3   :  { %716 = vmatprep.subr.mxu0 %v505_v14  ;;  %v775_v14 = vld [vmem:[%s2790_s4] sm:$0xff] }
 0x2b4   :  { %717 = vmatpush2.msra.mxu0 %v504_v15 }
 0x2b5   :  { %718 = vmatprep.subr.mxu0 %v499_v16 }
 0x2b6   :  { %719 = vmatpush2.msra.mxu0 %v498_v17  ;;  %v776_v17 = vld [vmem:[%s2790_s4 + $0x8] sm:$0xff] }
 0x2b7   :  { %720 = vmatprep.subr.mxu0 %v493_v18 }
 0x2b8   :  { %721 = vmatpush2.msra.mxu0 %v492_v19  ;;  %v773_v19 = vld [vmem:[%s2789_s3] sm:$0xff] }
 0x2b9   :  { %722 = vmatprep.subr.mxu0 %v487_v20 }
 0x2ba   :  { %723 = vmatpush2.msra.mxu0 %v486_v21 }
 0x2bb   :  { %724 = vmatprep.subr.mxu0 %v481_v22 }
 0x2bc   :  { %725 = vmatpush2.msra.mxu0 %v480_v26 }
 0x2bd   :  { %726 = vmatprep.subr.mxu0 %v475_v28 }
 0x2be   :  { %727 = vmatpush2.msra.mxu0 %v474_v31 }
 0x2bf   :  { %728 = vmatprep.subr.mxu0 %v469_v34 }
 0x2c0   :  { %729 = vmatpush2.msra.mxu0 %v468_v36 }
 0x2c1   :  { %730 = vmatprep.subr.mxu0 %v463_v37 }
 0x2c2   :  { %731 = vmatpush2.msra.mxu0 %v462_v23 }
 0x2c3   :  { %732 = vmatprep.subr.mxu0 %v457_v24 }
 0x2c4   :  { %733 = vmatpush2.msra.mxu0 %v456_v39 }
 0x2c5   :  { %734 = vmatprep.subr.mxu0 %v451_v40 }
 0x2c6   :  { %735 = vmatpush2.msra.mxu0 %v450_v41 }
 0x2c7   :  { %736 = vmatprep.subr.mxu0 %v445_v42 }
 0x2c8   :  { %737 = vmatpush2.msra.mxu0 %v444_v27 }
 0x2c9   :  { %738 = vmatprep.subr.mxu0 %v439_v32 }
 0x2ca   :  { %739 = vmatpush2.msra.mxu0 %v438_v44 }
 0x2cb   :  { %740 = vmatprep.subr.mxu0 %v433_v45 }
 0x2cc   :  { %741 = vmatpush2.msra.mxu0 %v432_v46 }
 0x2cd   :  { %742 = vmatprep.subr.mxu0 %v427_v47 }
 0x2ce   :  { %743 = vmatpush2.msra.mxu0 %v426_v25 }
 0x2cf   :  { %744 = vmatprep.subr.mxu0 %v421_v49 }
 0x2d0   :  { %745 = vmatpush2.msra.mxu0 %v420_v50 }
 0x2d1   :  { %746 = vmatprep.subr.mxu0 %v415_v51 }
 0x2d2   :  { %747 = vmatpush2.msra.mxu0 %v414_v52 }
 0x2d3   :  { %749 = vmatmul.mubr.f32.vlgmr.msra.gmra.mxu0 %v2218_v29  ;;  %1607 = vmatprep.subr.mxu0 %v2052_v38 }
 0x2d4   :  { %754 = vmatprep.mubr.f32.mxu0 %v2232_v43  ;;  %1608 = vmatpush1.msra.mxu0 %v2053_v54 }
 0x2d7   :  { %755 = vmatmul.mubr.f32.gmra.mxu0 %v2230_v33 }
 0x2d8   :  { %760 = vmatprep.mubr.f32.mxu0 %v2238_v48 }
 0x2db   :  { %761 = vmatmul.mubr.f32.gmra.mxu0 %v2244_v53 }
 0x2dc   :  { %766 = vmatprep.mubr.f32.mxu0 %v2246_v56 }
 0x2df   :  { %767 = vmatmul.mubr.f32.gmra.mxu0 %v2252_v59 }
 0x2e0   :  { %1641 = vmatprep.mubr.f32.mxu0 %v2081_v0 }
 0x351   :  { %v572_v55 = vpop.f32.mrf.mxu0  ;;  %v661_v63 = vpop.f32.mrf.mxu1 }
 0x353   :  { %v574_v57 = vpop.f32.mrf.mxu0  ;;  %v663_v2 = vpop.f32.mrf.mxu1 }
 0x358   :  { %v578_v35 = vpop.f32.mrf.mxu0  ;;  %v667_v4 = vpop.f32.mrf.mxu1 }
 0x35a   :  { %v580_v58 = vpop.f32.mrf.mxu0  ;;  %v669_v7 = vpop.f32.mrf.mxu1 }
 0x35c   :  { %v584_v60 = vpop.f32.mrf.mxu0 }
 0x35d   :  { %v673_v10 = vpop.f32.mrf.mxu1 }
 0x35e   :  { %v586_v61 = vpop.f32.mrf.mxu0 }
 0x35f   :  { %v675_v12 = vpop.f32.mrf.mxu1 }
 0x361   :  { %v590_v62 = vpop.f32.mrf.mxu0 }
 0x362   :  { %v679_v15 = vpop.f32.mrf.mxu1 }
 0x363   :  { %v592_v1 = vpop.f32.mrf.mxu0 }
 0x364   :  { %v681_v18 = vpop.f32.mrf.mxu1 }
 0x393   :  { %v750_v3 = vpop.f32.mrf.mxu0 }
 0x395   :  { %v752_v5 = vpop.f32.mrf.mxu0 }
 0x397   :  { %v756_v6 = vpop.f32.mrf.mxu0 }
 0x399   :  { %v758_v8 = vpop.f32.mrf.mxu0 }
 0x39a   :  { %804 = vmatprep.subr.mxu1 %v758_v8 }
 0x39b   :  { %v762_v9 = vpop.f32.mrf.mxu0  ;;  %805 = vmatpush1.msra.mxu1 %v756_v6 }
 0x39c   :  { %806 = vmatprep.subr.mxu1 %v752_v5 }
 0x39d   :  { %v764_v11 = vpop.f32.mrf.mxu0  ;;  %807 = vmatpush1.msra.mxu1 %v750_v3 }
 0x39e   :  { %808 = vmatprep.subr.mxu1 %v669_v7 }
 0x39f   :  { %809 = vmatpush1.msra.mxu1 %v667_v4  ;;  %v768_v13 = vpop.f32.mrf.mxu0 }
 0x3a0   :  { %810 = vmatprep.subr.mxu1 %v663_v2 }
 0x3a1   :  { %811 = vmatpush1.msra.mxu1 %v661_v63  ;;  %v770_v16 = vpop.f32.mrf.mxu0 }
 0x3a2   :  { %812 = vmatprep.subr.mxu1 %v580_v58 }
 0x3a3   :  { %813 = vmatpush1.msra.mxu1 %v578_v35 }
 0x3a4   :  { %814 = vmatprep.subr.mxu1 %v574_v57 }
 0x3a5   :  { %815 = vmatpush1.msra.mxu1 %v572_v55 }
 0x3a6   :  { %1987 = vmatmul.mubr.msk.f32.vlgmr.msra.gmra.mxu1 %vm777_vm1, %v775_v14  ;;  %881 = vmatprep.subr.mxu1 %v770_v16 }
 0x3a7   :  { %882 = vmatpush1.msra.mxu1 %v768_v13  ;;  %854 = vmatprep.mubr.f32.mxu1 %v2081_v0 }
 0x3a8   :  { %883 = vmatprep.subr.mxu1 %v764_v11 }
 0x3a9   :  { %884 = vmatpush1.msra.mxu1 %v762_v9 }
 0x3aa   :  { %885 = vmatprep.subr.mxu1 %v681_v18  ;;  %1988 = vmatmul.mubr.msk.f32.gmra.mxu1 %vm777_vm1, %v776_v17 }
 0x3ab   :  { %886 = vmatpush1.msra.mxu1 %v679_v15  ;;  %925 = vmatprep.mubr.f32.mxu1 %v2081_v0 }
 0x3ac   :  { %887 = vmatprep.subr.mxu1 %v675_v12 }
 0x3ad   :  { %888 = vmatpush1.msra.mxu1 %v673_v10 }
 0x3ae   :  { %889 = vmatprep.subr.mxu1 %v592_v1 }
 0x3af   :  { %890 = vmatpush1.msra.mxu1 %v590_v62 }
 0x3b0   :  { %891 = vmatprep.subr.mxu1 %v586_v61 }
 0x3b1   :  { %892 = vmatpush1.msra.mxu1 %v584_v60 }
 0x3b2   :  { %1989 = vmatmul.mubr.msk.f32.vlgmr.msra.gmra.mxu1 %vm777_vm1, %v775_v14  ;;  %973 = vmatprep.subr.mxu1 %v2232_v43  ;;  %v1996_v14 = vld [vmem:[%s2794_s8 + $0x18] sm:$0xff] }
 0x3b3   :  { %974 = vmatpush1.msra.mxu1 %v2230_v33  ;;  %931 = vmatprep.mubr.f32.mxu1 %v2081_v0 }
 0x3b4   :  { %975 = vmatprep.subr.mxu1 %v2220_v30 }
 0x3b5   :  { %976 = vmatpush1.msra.mxu1 %v2218_v29  ;;  %v774_v29 = vld [vmem:[%s2789_s3 + $0x8] sm:$0xff] }
 0x3b6   :  { %1990 = vmatmul.mubr.msk.f32.gmra.mxu1 %vm777_vm1, %v776_v17  ;;  %1050 = vmatprep.subr.mxu1 %v2246_v56 }
 0x3b7   :  { %1009 = vmatprep.mubr.f32.mxu1 %v2081_v0 }
 0x3ba   :  { %1991 = vmatmul.mubr.msk.f32.vlgmr.msra.gmra.mxu1 %vm938_vm2, %v773_v19 }
 0x3bb   :  { %1051 = vmatpush1.msra.mxu1 %v2252_v59  ;;  %1015 = vmatprep.mubr.f32.mxu1 %v2081_v0 }
 0x3bc   :  { %1052 = vmatprep.subr.mxu1 %v2238_v48 }
 0x3bd   :  { %1053 = vmatpush1.msra.mxu1 %v2244_v53 }
 0x3be   :  { %1992 = vmatmul.mubr.msk.f32.gmra.mxu1 %vm938_vm2, %v774_v29 }
 0x3bf   :  { %1086 = vmatprep.mubr.f32.mxu1 %v2081_v0 }
 0x3c2   :  { %1993 = vmatmul.mubr.msk.f32.vlgmr.msra.gmra.mxu1 %vm938_vm2, %v773_v19 }
 0x3c3   :  { %1092 = vmatprep.mubr.f32.mxu1 %v2081_v0 }
 0x3c6   :  { %1994 = vmatmul.mubr.msk.f32.gmra.mxu1 %vm938_vm2, %v774_v29 }
 0x3c7   :  { %1274 = vmatprep.mubr.f32.mxu1 %v2081_v0 }
 0x466   :  { %v850_v30 = vpop.f32.mrf.mxu1 }
 0x468   :  { %v852_v33 = vpop.f32.mrf.mxu1 }
 0x46a   :  { %v856_v43 = vpop.f32.mrf.mxu1 }
 0x46c   :  { %v858_v56 = vpop.f32.mrf.mxu1 }
 0x472   :  { %v927_v59 = vpop.f32.mrf.mxu1 }
 0x474   :  { %v929_v48 = vpop.f32.mrf.mxu1 }
 0x476   :  { %v933_v20 = vpop.f32.mrf.mxu1 }
 0x478   :  { %v935_v53 = vpop.f32.mrf.mxu1 }
 0x47a   :  { %v1011_v21 = vpop.f32.mrf.mxu1 }
 0x47b   :  { %v1012_v34 = vadd.f32 %v1011_v21, %v850_v30  ;;  %v1100_v30 = vld [vmem:[%s2794_s8 + $0x8] sm:$0xff] }
 0x47c   :  { %v1013_v22 = vpop.f32.mrf.mxu1  ;;  %v2339_v21 = vld [vmem:[%s2792_s6 + $0x8] sm:$0xff] }
 0x47d   :  { %v1014_v28 = vadd.f32 %v1013_v22, %v852_v33  ;;  %v2347_v22 = vld [vmem:[%s2792_s6 + $0x10] sm:$0xff] }
 0x47e   :  { %v1017_v26 = vpop.f32.mrf.mxu1 }
 0x47f   :  { %v1104_v37 = vadd.f32 %v1014_v28, %v1012_v34  ;;  %v1018_v40 = vadd.f32 %v1017_v26, %v856_v43  ;;  %v2355_v26 = vld [vmem:[%s2792_s6 + $0x18] sm:$0xff] }
 0x480   :  { %v1019_v31 = vpop.f32.mrf.mxu1 }
 0x481   :  { %v1020_v23 = vadd.f32 %v1019_v31, %v858_v56  ;;  %v1099_v56 = vld [vmem:[%s2794_s8] sm:$0xff] }
 0x482   :  { %v1088_v36 = vpop.f32.mrf.mxu1 }
 0x483   :  { %v1089_v24 = vadd.f32 %v1088_v36, %v927_v59  ;;  %v1109_v32 = vadd.f32 %v1020_v23, %v1018_v40 }
 0x484   :  { %v1090_v39 = vpop.f32.mrf.mxu1 }
 0x485   :  { %v1105_v41 = vadd.f32 %v1104_v37, %v1089_v24  ;;  %v1091_v42 = vadd.f32 %v1090_v39, %v929_v48  ;;  %v1995_v48 = vld [vmem:[%s2794_s8 + $0x10] sm:$0xff] }
 0x486   :  { %v1094_v27 = vpop.f32.mrf.mxu1 }
 0x487   :  { %v1095_v44 = vadd.f32 %v1094_v27, %v933_v20  ;;  %v1106_v45 = vadd.f32 %v1105_v41, %v1091_v42 }
 0x488   :  { %v1096_v46 = vpop.f32.mrf.mxu1 }
 0x489   :  { %v1110_v47 = vadd.f32 %v1109_v32, %v1095_v44  ;;  %v1097_v25 = vadd.f32 %v1096_v46, %v935_v53  ;;  %1107 = vadd.xlane.f32.xlu0 %v1106_v45  ;;  %v2331_v53 = vld [vmem:[%s2792_s6] sm:$0xff] }
 0x48a   :  { %2009 = vmatmul.mubr.msk.f32.vlgmr.msra.gmra.mxu0 %vm58_vm0, %v2331_v53 }
 0x48b   :  { %v1111_v49 = vadd.f32 %v1110_v47, %v1097_v25  ;;  %1647 = vmatprep.mubr.f32.mxu0 %v2081_v0 }
 0x48d   :  { %1112 = vadd.xlane.f32.xlu1 %v1111_v49 }
 0x48e   :  { %2010 = vmatmul.mubr.msk.f32.gmra.mxu0 %vm58_vm0, %v2339_v21 }
 0x48f   :  { %1653 = vmatprep.mubr.f32.mxu0 %v2081_v0 }
 0x492   :  { %2011 = vmatmul.mubr.msk.f32.gmra.mxu0 %vm58_vm0, %v2347_v22 }
 0x493   :  { %1659 = vmatprep.mubr.f32.mxu0 %v2081_v0 }
 0x496   :  { %2012 = vmatmul.mubr.msk.f32.gmra.mxu0 %vm58_vm0, %v2355_v26 }
 0x512   :  { %v1108_v50 = vpop.xlane.xlu0 %1107 }
 0x513   :  { %v1114_v51 = vmul.f32 0.001953125, %v1108_v50 }
 0x515   :  { %v2308_v52 = vsub.f32 %v1012_v34, %v1114_v51  ;;  %v2310_v38 = vsub.f32 %v1014_v28, %v1114_v51  ;;  %v1118_v2 = vsub.f32 %v1089_v24, %v1114_v51  ;;  %v1119_v8 = vsub.f32 %v1091_v42, %v1114_v51 }
 0x516   :  { %v1113_v54 = vpop.xlane.xlu1 %1112 }
 0x517   :  { %v1115_v55 = vmul.f32 0.001953125, %v1113_v54  ;;  %v1124_v57 = vmul.f32 %v2308_v52, %v2308_v52  ;;  %v1125_v61 = vmul.f32 %v2310_v38, %v2310_v38  ;;  %v1126_v9 = vmul.f32 %v1118_v2, %v1118_v2 }
 0x518   :  { %v1127_v12 = vmul.f32 %v1119_v8, %v1119_v8 }
 0x519   :  { %v1120_v35 = vsub.f32 %v1018_v40, %v1115_v55  ;;  %v1121_v58 = vsub.f32 %v1020_v23, %v1115_v55  ;;  %v1122_v60 = vsub.f32 %v1095_v44, %v1115_v55  ;;  %v1123_v62 = vsub.f32 %v1097_v25, %v1115_v55 }
 0x51a   :  { %v1132_v5 = vadd.f32 %v1125_v61, %v1124_v57  ;;  %v1195_v61 = vld [vmem:[%s2791_s5 + $0x8] sm:$0xff] }
 0x51b   :  { %v1128_v63 = vmul.f32 %v1120_v35, %v1120_v35  ;;  %v1129_v1 = vmul.f32 %v1121_v58, %v1121_v58  ;;  %v1130_v3 = vmul.f32 %v1122_v60, %v1122_v60  ;;  %v1131_v6 = vmul.f32 %v1123_v62, %v1123_v62 }
 0x51c   :  { %v1133_v11 = vadd.f32 %v1132_v5, %v1126_v9 }
 0x51d   :  { %v1137_v4 = vadd.f32 %v1129_v1, %v1128_v63  ;;  %v1196_v63 = vld [vmem:[%s2791_s5 + $0x10] sm:$0xff]  ;;  %v1197_v1 = vld [vmem:[%s2791_s5 + $0x18] sm:$0xff] }
 0x51e   :  { %v1134_v13 = vadd.f32 %v1133_v11, %v1127_v12 }
 0x51f   :  { %v1138_v7 = vadd.f32 %v1137_v4, %v1130_v3 }
 0x521   :  { %v1139_v10 = vadd.f32 %v1138_v7, %v1131_v6 }
 0x523   :  { %1140 = vadd.xlane.f32.xlu1 %v1139_v10 }
 0x527   :  { %1135 = vadd.xlane.f32.xlu1 %v1134_v13 }
 0x538   :  { %1175 = vperm.xlu1 %2027, %v1996_v14  }
 0x54a   :  { %v2420_v10 = vpop.f32.mrf.mxu0 }
 0x54c   :  { %v2426_v13 = vpop.f32.mrf.mxu0 }
 0x5ac   :  { %v1141_v15 = vpop.xlane.xlu1 %1140 }
 0x5ad   :  { %v1143_v16 = vmul.f32 0.001953125, %v1141_v15 }
 0x5af   :  { %v1145_v17 = vadd.f32 1e-05, %v1143_v16 }
 0x5b0   :  { %v1136_v18 = vpop.xlane.xlu1 %1135 }
 0x5b1   :  { %2032 = vrsqrt.f32 %v1145_v17  ;;  %v1142_v19 = vmul.f32 0.001953125, %v1136_v18 }
 0x5b3   :  { %v1144_v29 = vadd.f32 1e-05, %v1142_v19  ;;  %v2430_v19 = vpop.f32.mrf.mxu0 }
 0x5b4   :  { %v1176_v28 = vpop.permute.xlu1 %1175 }
 0x5b5   :  { %2034 = vrsqrt.f32 %v1144_v29 }
 0x5be   :  { %v2033_v33 = vpop.eup %2032 }
 0x5bf   :  { %v1149_v43 = vmul.f32 %v2033_v33, %v1100_v30 }
 0x5c1   :  { %1157 = vperm.xlu1 %2027, %v1149_v43  }
 0x5c2   :  { %v2035_v59 = vpop.eup %2034 }
 0x5c3   :  { %v1148_v20 = vmul.f32 %v2035_v59, %v1099_v56  ;;  %v2436_v59 = vpop.f32.mrf.mxu0 }
 0x5c5   :  { %1170 = vperm.xlu1 %2027, %v1995_v48   ;;  %1152 = vperm.xlu0 %2026, %v1148_v20  }
 0x63c   :  { %v1158_v31 = vpop.permute.xlu1 %1157 }
 0x63d   :  { %v1164_v34 = vmul.f32 %v1158_v31, %v1120_v35  ;;  %v1165_v36 = vmul.f32 %v1158_v31, %v1121_v58  ;;  %v1167_v37 = vmul.f32 %v1158_v31, %v1123_v62  ;;  %v1166_v39 = vmul.f32 %v1158_v31, %v1122_v60  ;;  %v2054_v62 = vld [vmem:[%s2786_s0 + $0x18] sm:$0xff] }
 0x63f   :  { %v1182_v23 = vadd.f32 %v1176_v28, %v1164_v34  ;;  %v1183_v24 = vadd.f32 %v1176_v28, %v1165_v36  ;;  %v1185_v49 = vadd.f32 %v1176_v28, %v1167_v37  ;;  %v1184_v50 = vadd.f32 %v1176_v28, %v1166_v39 }
 0x640   :  { %v1153_v40 = vpop.permute.xlu0 %1152  ;;  %v1171_v44 = vpop.permute.xlu1 %1170  ;;  %v1764_v34 = vadd.f32 %v2426_v13, %v2420_v10 }
 0x641   :  { %v1160_v41 = vmul.f32 %v1153_v40, %v2308_v52  ;;  %v1161_v42 = vmul.f32 %v1153_v40, %v2310_v38  ;;  %v1163_v27 = vmul.f32 %v1153_v40, %v1119_v8  ;;  %v1162_v32 = vmul.f32 %v1153_v40, %v1118_v2  ;;  %v1194_v52 = vld [vmem:[%s2791_s5] sm:$0xff]  ;;  %v2055_v2 = vld [vmem:[%s2786_s0 + $0x10] sm:$0xff] }
 0x642   :  { %v1191_v45 = vmax.f32 %v1183_v24, 0.0  ;;  %v1190_v46 = vmax.f32 %v1182_v23, 0.0  ;;  %v1193_v38 = vmax.f32 %v1185_v49, 0.0  ;;  %v1192_v35 = vmax.f32 %v1184_v50, 0.0 }
 0x643   :  { %v1178_v47 = vadd.f32 %v1171_v44, %v1160_v41  ;;  %v1179_v25 = vadd.f32 %v1171_v44, %v1161_v42  ;;  %v1181_v55 = vadd.f32 %v1171_v44, %v1163_v27  ;;  %v1180_v57 = vadd.f32 %v1171_v44, %v1162_v32 }
 0x644   :  { %1238 = vmatprep.subr.mxu1 %v1191_v45  ;;  %v1769_v40 = vadd.f32 %v2436_v59, %v2430_v19 }
 0x645   :  { %v1186_v51 = vmax.f32 %v1178_v47, 0.0  ;;  %1239 = vmatpush1.msra.mxu1 %v1190_v46  ;;  %v1187_v54 = vmax.f32 %v1179_v25, 0.0  ;;  %v1189_v58 = vmax.f32 %v1181_v55, 0.0  ;;  %v1188_v60 = vmax.f32 %v1180_v57, 0.0 }
 0x647   :  { %1240 = vmatprep.subr.mxu1 %v1187_v54 }
 0x648   :  { %1241 = vmatpush1.msra.mxu1 %v1186_v51 }
 0x649   :  { %1997 = vmatmul.mubr.msk.f32.vlgmr.msra.gmra.mxu1 %vm938_vm2, %v1194_v52  ;;  %1327 = vmatprep.subr.mxu1 %v1193_v38 }
 0x64a   :  { %1328 = vmatpush1.msra.mxu1 %v1192_v35  ;;  %1280 = vmatprep.mubr.f32.mxu1 %v2081_v0 }
 0x64b   :  { %1329 = vmatprep.subr.mxu1 %v1189_v58 }
 0x64c   :  { %1330 = vmatpush1.msra.mxu1 %v1188_v60 }
 0x64d   :  { %1998 = vmatmul.mubr.msk.f32.gmra.mxu1 %vm938_vm2, %v1195_v61  ;;  %1696 = vmatprep.subr.mxu1 %v2054_v62 }
 0x64e   :  { %1286 = vmatprep.mubr.f32.mxu1 %v2081_v0 }
 0x651   :  { %1999 = vmatmul.mubr.msk.f32.gmra.mxu1 %vm938_vm2, %v1196_v63 }
 0x652   :  { %1292 = vmatprep.mubr.f32.mxu1 %v2081_v0 }
 0x655   :  { %2000 = vmatmul.mubr.msk.f32.gmra.mxu1 %vm938_vm2, %v1197_v1 }
 0x656   :  { %1363 = vmatprep.mubr.f32.mxu1 %v2081_v0 }
 0x659   :  { %2001 = vmatmul.mubr.msk.f32.vlgmr.msra.gmra.mxu1 %vm938_vm2, %v1194_v52 }
 0x65a   :  { %1369 = vmatprep.mubr.f32.mxu1 %v2081_v0  ;;  %1697 = vmatpush1.msra.mxu1 %v2055_v2 }
 0x65d   :  { %2002 = vmatmul.mubr.msk.f32.gmra.mxu1 %vm938_vm2, %v1195_v61 }
 0x65e   :  { %1375 = vmatprep.mubr.f32.mxu1 %v2081_v0 }
 0x661   :  { %2003 = vmatmul.mubr.msk.f32.gmra.mxu1 %vm938_vm2, %v1196_v63 }
 0x662   :  { %1381 = vmatprep.mubr.f32.mxu1 %v2081_v0 }
 0x665   :  { %2004 = vmatmul.mubr.msk.f32.gmra.mxu1 %vm938_vm2, %v1197_v1 }
 0x666   :  { %1730 = vmatprep.mubr.f32.mxu1 %v2081_v0 }
 0x669   :  { %2013 = vmatmul.mubr.msk.f32.vlgmr.msra.gmra.mxu1 %vm58_vm0, %v2331_v53 }
 0x66a   :  { %1736 = vmatprep.mubr.f32.mxu1 %v2081_v0 }
 0x66d   :  { %2014 = vmatmul.mubr.msk.f32.gmra.mxu1 %vm58_vm0, %v2339_v21 }
 0x66e   :  { %1742 = vmatprep.mubr.f32.mxu1 %v2081_v0 }
 0x671   :  { %2015 = vmatmul.mubr.msk.f32.gmra.mxu1 %vm58_vm0, %v2347_v22 }
 0x672   :  { %1748 = vmatprep.mubr.f32.mxu1 %v2081_v0 }
 0x675   :  { %2016 = vmatmul.mubr.msk.f32.gmra.mxu1 %vm58_vm0, %v2355_v26  ;;  %v2446_v26 = vpop.f32.mrf.mxu0 }
 0x677   :  { %v2456_v23 = vpop.f32.mrf.mxu0 }
 0x678   :  { %v1774_v45 = vadd.f32 %v2456_v23, %v2446_v26 }
 0x679   :  { %v2466_v27 = vpop.f32.mrf.mxu0 }
 0x67b   :  { %v2476_v25 = vpop.f32.mrf.mxu0 }
 0x67c   :  { %v1779_v51 = vadd.f32 %v2476_v25, %v2466_v27 }
 0x709   :  { %v2406_v3 = vpop.f32.mrf.mxu1 }
 0x70b   :  { %v2408_v4 = vpop.f32.mrf.mxu1 }
 0x70c   :  { %v1397_v11 = vadd.f32 %v2408_v4, %v2406_v3 }
 0x70d   :  { %v2410_v5 = vpop.f32.mrf.mxu1 }
 0x70f   :  { %v2412_v6 = vpop.f32.mrf.mxu1 }
 0x710   :  { %v1402_v16 = vadd.f32 %v2412_v6, %v2410_v5 }
 0x711   :  { %v2414_v7 = vpop.f32.mrf.mxu1 }
 0x713   :  { %v2416_v8 = vpop.f32.mrf.mxu1 }
 0x714   :  { %v1407_v33 = vadd.f32 %v2416_v8, %v2414_v7 }
 0x715   :  { %v2418_v9 = vpop.f32.mrf.mxu1 }
 0x717   :  { %v2422_v0 = vpop.f32.mrf.mxu1 }
 0x718   :  { %v1412_v53 = vadd.f32 %v2422_v0, %v2418_v9 }
 0x719   :  { %v1365_v12 = vpop.f32.mrf.mxu1 }
 0x71a   :  { %v1398_v14 = vadd.f32 %v1397_v11, %v1365_v12 }
 0x71b   :  { %v1367_v15 = vpop.f32.mrf.mxu1 }
 0x71c   :  { %v1399_v17 = vadd.f32 %v1398_v14, %v1367_v15 }
 0x71d   :  { %v1371_v18 = vpop.f32.mrf.mxu1 }
 0x71e   :  { %v1403_v29 = vadd.f32 %v1402_v16, %v1371_v18  ;;  %1400 = vadd.xlane.f32.xlu1 %v1399_v17 }
 0x71f   :  { %v1373_v30 = vpop.f32.mrf.mxu1 }
 0x720   :  { %v1404_v43 = vadd.f32 %v1403_v29, %v1373_v30 }
 0x721   :  { %v2434_v56 = vpop.f32.mrf.mxu1 }
 0x722   :  { %v1408_v48 = vadd.f32 %v1407_v33, %v2434_v56  ;;  %1405 = vadd.xlane.f32.xlu0 %v1404_v43 }
 0x723   :  { %v2439_v20 = vpop.f32.mrf.mxu1 }
 0x724   :  { %v1409_v21 = vadd.f32 %v1408_v48, %v2439_v20 }
 0x725   :  { %v2444_v22 = vpop.f32.mrf.mxu1 }
 0x726   :  { %v1413_v28 = vadd.f32 %v1412_v53, %v2444_v22  ;;  %1410 = vadd.xlane.f32.xlu0 %v1409_v21 }
 0x727   :  { %v2449_v31 = vpop.f32.mrf.mxu1 }
 0x728   :  { %v1414_v36 = vadd.f32 %v1413_v28, %v2449_v31 }
 0x729   :  { %v2454_v37 = vpop.f32.mrf.mxu1 }
 0x72a   :  { %v1765_v24 = vadd.f32 %v1764_v34, %v2454_v37  ;;  %1415 = vadd.xlane.f32.xlu1 %v1414_v36 }
 0x72b   :  { %v2459_v39 = vpop.f32.mrf.mxu1 }
 0x72c   :  { %v1766_v41 = vadd.f32 %v1765_v24, %v2459_v39 }
 0x72d   :  { %v2464_v42 = vpop.f32.mrf.mxu1 }
 0x72e   :  { %v1770_v32 = vadd.f32 %v1769_v40, %v2464_v42  ;;  %1767 = vadd.xlane.f32.xlu0 %v1766_v41 }
 0x72f   :  { %v2469_v44 = vpop.f32.mrf.mxu1 }
 0x730   :  { %v1771_v46 = vadd.f32 %v1770_v32, %v2469_v44 }
 0x731   :  { %v2474_v47 = vpop.f32.mrf.mxu1 }
 0x732   :  { %v1775_v49 = vadd.f32 %v1774_v45, %v2474_v47  ;;  %1772 = vadd.xlane.f32.xlu1 %v1771_v46 }
 0x733   :  { %v2479_v50 = vpop.f32.mrf.mxu1 }
 0x734   :  { %v1776_v54 = vadd.f32 %v1775_v49, %v2479_v50 }
 0x735   :  { %v2484_v55 = vpop.f32.mrf.mxu1 }
 0x736   :  { %v1780_v57 = vadd.f32 %v1779_v51, %v2484_v55  ;;  %1777 = vadd.xlane.f32.xlu0 %v1776_v54 }
 0x737   :  { %v2487_v52 = vpop.f32.mrf.mxu1 }
 0x738   :  { %v1781_v38 = vadd.f32 %v1780_v57, %v2487_v52 }
 0x73a   :  { %1782 = vadd.xlane.f32.xlu1 %v1781_v38 }
 0x7a7   :  { %v1401_v35 = vpop.xlane.xlu1 %1400 }
 0x7a8   :  { %v1417_v58 = vmul.f32 0.001953125, %v1401_v35 }
 0x7aa   :  { %v2491_v60 = vsub.f32 %v2406_v3, %v1417_v58  ;;  %v2494_v61 = vsub.f32 %v2408_v4, %v1417_v58  ;;  %v2496_v62 = vsub.f32 %v1365_v12, %v1417_v58  ;;  %v2498_v1 = vsub.f32 %v1367_v15, %v1417_v58 }
 0x7ab   :  { %v1406_v63 = vpop.xlane.xlu0 %1405 }
 0x7ac   :  { %v1418_v2 = vmul.f32 0.001953125, %v1406_v63  ;;  %v1437_v11 = vmul.f32 %v2491_v60, %v2491_v60  ;;  %v1438_v14 = vmul.f32 %v2494_v61, %v2494_v61  ;;  %v1439_v16 = vmul.f32 %v2496_v62, %v2496_v62 }
 0x7ad   :  { %v1440_v29 = vmul.f32 %v2498_v1, %v2498_v1 }
 0x7ae   :  { %v2507_v3 = vsub.f32 %v2410_v5, %v1418_v2  ;;  %v2510_v4 = vsub.f32 %v2412_v6, %v1418_v2  ;;  %v1453_v12 = vadd.f32 %v1438_v14, %v1437_v11  ;;  %v2512_v17 = vsub.f32 %v1371_v18, %v1418_v2 }
 0x7af   :  { %v1411_v15 = vpop.xlane.xlu0 %1410  ;;  %v2516_v33 = vsub.f32 %v1373_v30, %v1418_v2 }
 0x7b0   :  { %v1419_v43 = vmul.f32 0.001953125, %v1411_v15  ;;  %v1454_v48 = vadd.f32 %v1453_v12, %v1439_v16  ;;  %v1441_v53 = vmul.f32 %v2507_v3, %v2507_v3  ;;  %v1442_v5 = vmul.f32 %v2510_v4, %v2510_v4 }
 0x7b1   :  { %v1443_v6 = vmul.f32 %v2512_v17, %v2512_v17  ;;  %v1444_v36 = vmul.f32 %v2516_v33, %v2516_v33 }
 0x7b2   :  { %v2525_v18 = vsub.f32 %v2414_v7, %v1419_v43  ;;  %v2528_v21 = vsub.f32 %v2416_v8, %v1419_v43  ;;  %v1455_v28 = vadd.f32 %v1454_v48, %v1440_v29  ;;  %v1458_v30 = vadd.f32 %v1442_v5, %v1441_v53 }
 0x7b3   :  { %v1416_v34 = vpop.xlane.xlu1 %1415  ;;  %v2533_v24 = vsub.f32 %v2434_v56, %v1419_v43  ;;  %v2536_v40 = vsub.f32 %v2439_v20, %v1419_v43 }
 0x7b4   :  { %v1420_v41 = vmul.f32 0.001953125, %v1416_v34  ;;  %1456 = vadd.xlane.f32.xlu0 %v1455_v28  ;;  %v1459_v32 = vadd.f32 %v1458_v30, %v1443_v6  ;;  %v1445_v7 = vmul.f32 %v2525_v18, %v2525_v18  ;;  %v1446_v8 = vmul.f32 %v2528_v21, %v2528_v21 }
 0x7b5   :  { %v1447_v45 = vmul.f32 %v2533_v24, %v2533_v24  ;;  %v1448_v54 = vmul.f32 %v2536_v40, %v2536_v40 }
 0x7b6   :  { %v2545_v46 = vsub.f32 %v2418_v9, %v1420_v41  ;;  %v2548_v56 = vsub.f32 %v2422_v0, %v1420_v41  ;;  %v1460_v20 = vadd.f32 %v1459_v32, %v1444_v36  ;;  %v1463_v49 = vadd.f32 %v1446_v8, %v1445_v7 }
 0x7b7   :  { %v1768_v51 = vpop.xlane.xlu0 %1767  ;;  %v2553_v57 = vsub.f32 %v2444_v22, %v1420_v41  ;;  %v2556_v38 = vsub.f32 %v2449_v31, %v1420_v41 }
 0x7b8   :  { %v1784_v35 = vmul.f32 0.001953125, %v1768_v51  ;;  %1461 = vadd.xlane.f32.xlu1 %v1460_v20  ;;  %v1464_v58 = vadd.f32 %v1463_v49, %v1447_v45  ;;  %v1449_v9 = vmul.f32 %v2545_v46, %v2545_v46  ;;  %v1450_v0 = vmul.f32 %v2548_v56, %v2548_v56 }
 0x7b9   :  { %v1451_v63 = vmul.f32 %v2553_v57, %v2553_v57  ;;  %v1452_v16 = vmul.f32 %v2556_v38, %v2556_v38 }
 0x7ba   :  { %v2565_v2 = vsub.f32 %v2420_v10, %v1784_v35  ;;  %v2568_v22 = vsub.f32 %v2426_v13, %v1784_v35  ;;  %v1465_v31 = vadd.f32 %v1464_v58, %v1448_v54  ;;  %v1468_v11 = vadd.f32 %v1450_v0, %v1449_v9 }
 0x7bb   :  { %v1773_v14 = vpop.xlane.xlu1 %1772  ;;  %v2573_v12 = vsub.f32 %v2454_v37, %v1784_v35  ;;  %v2576_v15 = vsub.f32 %v2459_v39, %v1784_v35 }
 0x7bc   :  { %v1785_v29 = vmul.f32 0.001953125, %v1773_v14  ;;  %1466 = vadd.xlane.f32.xlu0 %v1465_v31  ;;  %v1469_v43 = vadd.f32 %v1468_v11, %v1451_v63  ;;  %v1804_v10 = vmul.f32 %v2565_v2, %v2565_v2  ;;  %v1805_v13 = vmul.f32 %v2568_v22, %v2568_v22 }
 0x7bd   :  { %v1806_v48 = vmul.f32 %v2573_v12, %v2573_v12  ;;  %v1807_v28 = vmul.f32 %v2576_v15, %v2576_v15 }
 0x7be   :  { %v2585_v53 = vsub.f32 %v2430_v19, %v1785_v29  ;;  %v2588_v37 = vsub.f32 %v2436_v59, %v1785_v29  ;;  %v1470_v39 = vadd.f32 %v1469_v43, %v1452_v16  ;;  %v1820_v5 = vadd.f32 %v1805_v13, %v1804_v10 }
 0x7bf   :  { %v1778_v6 = vpop.xlane.xlu0 %1777  ;;  %v2593_v30 = vsub.f32 %v2464_v42, %v1785_v29  ;;  %v2596_v34 = vsub.f32 %v2469_v44, %v1785_v29 }
 0x7c0   :  { %v1786_v36 = vmul.f32 0.001953125, %v1778_v6  ;;  %1471 = vadd.xlane.f32.xlu1 %v1470_v39  ;;  %v1821_v41 = vadd.f32 %v1820_v5, %v1806_v48  ;;  %v1808_v19 = vmul.f32 %v2585_v53, %v2585_v53  ;;  %v1809_v59 = vmul.f32 %v2588_v37, %v2588_v37  ;;  %v2006_v48 = vld [vmem:[%s2795_s9 + $0x28] sm:$0xff]  ;;  %v2007_v39 = vld [vmem:[%s2795_s9 + $0x30] sm:$0xff]  ;;  %v2008_v5 = vld [vmem:[%s2795_s9 + $0x38] sm:$0xff] }
 0x7c1   :  { %v1810_v32 = vmul.f32 %v2593_v30, %v2593_v30  ;;  %v1811_v20 = vmul.f32 %v2596_v34, %v2596_v34  ;;  %v2017_v6 = vld [vmem:[%s2796_s10 + $0x20] sm:$0xff] }
 0x7c2   :  { %v2605_v7 = vsub.f32 %v2446_v26, %v1786_v36  ;;  %v2608_v42 = vsub.f32 %v2456_v23, %v1786_v36  ;;  %v1822_v44 = vadd.f32 %v1821_v41, %v1807_v28  ;;  %v1825_v8 = vadd.f32 %v1809_v59, %v1808_v19  ;;  %v2018_v28 = vld [vmem:[%s2796_s10 + $0x28] sm:$0xff] }
 0x7c3   :  { %v1783_v45 = vpop.xlane.xlu1 %1782  ;;  %v2613_v49 = vsub.f32 %v2474_v47, %v1786_v36  ;;  %v2616_v51 = vsub.f32 %v2479_v50, %v1786_v36 }
 0x7c4   :  { %v1787_v54 = vmul.f32 0.001953125, %v1783_v45  ;;  %1823 = vadd.xlane.f32.xlu0 %v1822_v44  ;;  %v1826_v35 = vadd.f32 %v1825_v8, %v1810_v32  ;;  %v1812_v26 = vmul.f32 %v2605_v7, %v2605_v7  ;;  %v1813_v23 = vmul.f32 %v2608_v42, %v2608_v42 }
 0x7c5   :  { %v1814_v58 = vmul.f32 %v2613_v49, %v2613_v49  ;;  %v1815_v63 = vmul.f32 %v2616_v51, %v2616_v51 }
 0x7c6   :  { %v2625_v9 = vsub.f32 %v2466_v27, %v1787_v54  ;;  %v2628_v47 = vsub.f32 %v2476_v25, %v1787_v54  ;;  %v1827_v50 = vadd.f32 %v1826_v35, %v1811_v20  ;;  %v1830_v0 = vadd.f32 %v1813_v23, %v1812_v26 }
 0x7c7   :  { %v2633_v31 = vsub.f32 %v2484_v55, %v1787_v54  ;;  %v2636_v14 = vsub.f32 %v2487_v52, %v1787_v54  ;;  %v2005_v52 = vld [vmem:[%s2795_s9 + $0x20] sm:$0xff] }
 0x7c8   :  { %1828 = vadd.xlane.f32.xlu1 %v1827_v50  ;;  %v1831_v11 = vadd.f32 %v1830_v0, %v1814_v58  ;;  %v1816_v27 = vmul.f32 %v2625_v9, %v2625_v9  ;;  %v1817_v25 = vmul.f32 %v2628_v47, %v2628_v47  ;;  %v1388_v58 = vld [vmem:[%s2795_s9] sm:$0xff] }
 0x7c9   :  { %v1818_v29 = vmul.f32 %v2633_v31, %v2633_v31  ;;  %v1819_v55 = vmul.f32 %v2636_v14, %v2636_v14 }
 0x7ca   :  { %v1832_v16 = vadd.f32 %v1831_v11, %v1815_v63  ;;  %v1835_v43 = vadd.f32 %v1817_v25, %v1816_v27  ;;  %v1389_v25 = vld [vmem:[%s2795_s9 + $0x8] sm:$0xff] }
 0x7cc   :  { %1833 = vadd.xlane.f32.xlu0 %v1832_v16  ;;  %v1836_v10 = vadd.f32 %v1835_v43, %v1818_v29 }
 0x7ce   :  { %v1837_v13 = vadd.f32 %v1836_v10, %v1819_v55 }
 0x7d0   :  { %1838 = vadd.xlane.f32.xlu1 %v1837_v13  ;;  %v1390_v13 = vld [vmem:[%s2795_s9 + $0x10] sm:$0xff] }
 0x7e1   :  { %1527 = vperm.xlu1 %2027, %v2005_v52  }
 0x7e2   :  { %1532 = vperm.xlu0 %2026, %v2006_v48  }
 0x7e5   :  { %1537 = vperm.xlu1 %2027, %v2007_v39  }
 0x7e6   :  { %1542 = vperm.xlu0 %2026, %v2008_v5  }
 0x7e9   :  { %1894 = vperm.xlu1 %2027, %v2017_v6  }
 0x7ea   :  { %1899 = vperm.xlu0 %2026, %v2018_v28   ;;  %v1391_v28 = vld [vmem:[%s2795_s9 + $0x18] sm:$0xff] }
 0x83d   :  { %v1457_v36 = vpop.xlane.xlu0 %1456 }
 0x83e   :  { %v1473_v41 = vmul.f32 0.001953125, %v1457_v36 }
 0x840   :  { %v1477_v19 = vadd.f32 1e-05, %v1473_v41 }
 0x841   :  { %v1462_v59 = vpop.xlane.xlu1 %1461 }
 0x842   :  { %2036 = vrsqrt.f32 %v1477_v19  ;;  %v1474_v32 = vmul.f32 0.001953125, %v1462_v59 }
 0x844   :  { %v1478_v44 = vadd.f32 1e-05, %v1474_v32  ;;  %v1755_v32 = vld [vmem:[%s2796_s10] sm:$0xff] }
 0x845   :  { %v1467_v8 = vpop.xlane.xlu0 %1466 }
 0x846   :  { %2038 = vrsqrt.f32 %v1478_v44  ;;  %v1475_v45 = vmul.f32 0.001953125, %v1467_v8 }
 0x848   :  { %v1479_v20 = vadd.f32 1e-05, %v1475_v45  ;;  %v1756_v45 = vld [vmem:[%s2796_s10 + $0x8] sm:$0xff] }
 0x849   :  { %v1472_v54 = vpop.xlane.xlu1 %1471 }
 0x84a   :  { %2040 = vrsqrt.f32 %v1479_v20  ;;  %v1476_v35 = vmul.f32 0.001953125, %v1472_v54 }
 0x84c   :  { %v1480_v26 = vadd.f32 1e-05, %v1476_v35  ;;  %v1757_v35 = vld [vmem:[%s2796_s10 + $0x10] sm:$0xff] }
 0x84d   :  { %v1824_v23 = vpop.xlane.xlu0 %1823 }
 0x84e   :  { %2042 = vrsqrt.f32 %v1480_v26  ;;  %v1840_v50 = vmul.f32 0.001953125, %v1824_v23 }
 0x84f   :  { %v2037_v0 = vpop.eup %2036 }
 0x850   :  { %v1844_v63 = vadd.f32 1e-05, %v1840_v50  ;;  %v1485_v11 = vmul.f32 %v2037_v0, %v1388_v58  ;;  %v1758_v58 = vld [vmem:[%s2796_s10 + $0x18] sm:$0xff] }
 0x851   :  { %v1829_v27 = vpop.xlane.xlu1 %1828  ;;  %v2020_v0 = vld [vmem:[%s2796_s10 + $0x38] sm:$0xff] }
 0x852   :  { %2044 = vrsqrt.f32 %v1844_v63  ;;  %v1841_v16 = vmul.f32 0.001953125, %v1829_v27  ;;  %1491 = vperm.xlu0 %2026, %v1485_v11   ;;  %v2019_v11 = vld [vmem:[%s2796_s10 + $0x30] sm:$0xff] }
 0x853   :  { %v2039_v29 = vpop.eup %2038 }
 0x854   :  { %v1845_v43 = vadd.f32 1e-05, %v1841_v16  ;;  %v1486_v55 = vmul.f32 %v2039_v29, %v1389_v25 }
 0x855   :  { %v1834_v10 = vpop.xlane.xlu0 %1833 }
 0x856   :  { %2046 = vrsqrt.f32 %v1845_v43  ;;  %v1842_v52 = vmul.f32 0.001953125, %v1834_v10  ;;  %1496 = vperm.xlu1 %2027, %v1486_v55  }
 0x857   :  { %v2041_v48 = vpop.eup %2040 }
 0x858   :  { %v1846_v39 = vadd.f32 1e-05, %v1842_v52  ;;  %v1487_v5 = vmul.f32 %v2041_v48, %v1390_v13 }
 0x859   :  { %v1839_v6 = vpop.xlane.xlu1 %1838 }
 0x85a   :  { %2048 = vrsqrt.f32 %v1846_v39  ;;  %v1843_v36 = vmul.f32 0.001953125, %v1839_v6  ;;  %1501 = vperm.xlu1 %2027, %v1487_v5  }
 0x85b   :  { %v2043_v41 = vpop.eup %2042 }
 0x85c   :  { %v1847_v19 = vadd.f32 1e-05, %v1843_v36  ;;  %v1488_v59 = vmul.f32 %v2043_v41, %v1391_v28 }
 0x85d   :  { %v1533_v27 = vpop.permute.xlu0 %1532  ;;  %v1528_v25 = vpop.permute.xlu1 %1527 }
 0x85e   :  { %2050 = vrsqrt.f32 %v1847_v19  ;;  %1506 = vperm.xlu0 %2026, %v1488_v59  }
 0x85f   :  { %v2045_v44 = vpop.eup %2044 }
 0x860   :  { %v1852_v8 = vmul.f32 %v2045_v44, %v1755_v32 }
 0x861   :  { %v2694_v16 = vpop.permute.xlu0 %1542  ;;  %v2696_v29 = vpop.permute.xlu1 %1537 }
 0x862   :  { %1858 = vperm.xlu0 %2026, %v1852_v8  }
 0x863   :  { %v2047_v20 = vpop.eup %2046 }
 0x864   :  { %v1853_v54 = vmul.f32 %v2047_v20, %v1756_v45 }
 0x865   :  { %v1900_v43 = vpop.permute.xlu0 %1899  ;;  %v1895_v55 = vpop.permute.xlu1 %1894 }
 0x866   :  { %1863 = vperm.xlu1 %2027, %v1853_v54  }
 0x867   :  { %v2049_v26 = vpop.eup %2048 }
 0x868   :  { %v1854_v23 = vmul.f32 %v2049_v26, %v1757_v35 }
 0x86a   :  { %1868 = vperm.xlu0 %2026, %v1854_v23  }
 0x86b   :  { %v2051_v50 = vpop.eup %2050 }
 0x86c   :  { %v1855_v63 = vmul.f32 %v2051_v50, %v1758_v58 }
 0x86e   :  { %1909 = vperm.xlu0 %2026, %v2020_v0   ;;  %1873 = vperm.xlu1 %2027, %v1855_v63  }
 0x872   :  { %1904 = vperm.xlu1 %2027, %v2019_v11  }
 0x8cd   :  { %v1492_v10 = vpop.permute.xlu0 %1491 }
 0x8ce   :  { %v1509_v52 = vmul.f32 %v1492_v10, %v2491_v60  ;;  %v1510_v48 = vmul.f32 %v1492_v10, %v2494_v61  ;;  %v1511_v39 = vmul.f32 %v1492_v10, %v2496_v62  ;;  %v1512_v5 = vmul.f32 %v1492_v10, %v2498_v1 }
 0x8d0   :  { %v1545_v59 = vadd.f32 %v1528_v25, %v1509_v52  ;;  %v1546_v32 = vadd.f32 %v1528_v25, %v1510_v48  ;;  %v1547_v44 = vadd.f32 %v1528_v25, %v1511_v39  ;;  %v1548_v8 = vadd.f32 %v1528_v25, %v1512_v5 }
 0x8d1   :  { %v1497_v13 = vpop.permute.xlu1 %1496 }
 0x8d2   :  { %v1513_v28 = vmul.f32 %v1497_v13, %v2507_v3  ;;  %v1514_v36 = vmul.f32 %v1497_v13, %v2510_v4  ;;  %v1515_v41 = vmul.f32 %v1497_v13, %v2512_v17  ;;  %v1516_v19 = vmul.f32 %v1497_v13, %v2516_v33 }
 0x8d4   :  { %v1549_v20 = vadd.f32 %v1533_v27, %v1513_v28  ;;  %v1550_v4 = vadd.f32 %v1533_v27, %v1514_v36  ;;  %v1551_v54 = vadd.f32 %v1533_v27, %v1515_v41  ;;  %v1552_v17 = vadd.f32 %v1533_v27, %v1516_v19 }
 0x8d5   :  { %v1502_v60 = vpop.permute.xlu1 %1501 }
 0x8d6   :  { %v1517_v58 = vmul.f32 %v1502_v60, %v2525_v18  ;;  %v1518_v50 = vmul.f32 %v1502_v60, %v2528_v21 }
 0x8d9   :  { %v1507_v6 = vpop.permute.xlu0 %1506 }
 0x8da   :  { %v1521_v28 = vmul.f32 %v1507_v6, %v2545_v46  ;;  %v1522_v36 = vmul.f32 %v1507_v6, %v2548_v56 }
 0x8dd   :  { %v1859_v45 = vpop.permute.xlu0 %1858 }
 0x8de   :  { %v1876_v61 = vmul.f32 %v1859_v45, %v2565_v2  ;;  %v1877_v62 = vmul.f32 %v1859_v45, %v2568_v22  ;;  %v1878_v1 = vmul.f32 %v1859_v45, %v2573_v12  ;;  %v1879_v3 = vmul.f32 %v1859_v45, %v2576_v15 }
 0x8df   :  { %v1519_v2 = vmul.f32 %v1502_v60, %v2533_v24  ;;  %v1520_v22 = vmul.f32 %v1502_v60, %v2536_v40 }
 0x8e0   :  { %v1912_v35 = vadd.f32 %v1895_v55, %v1876_v61  ;;  %v1913_v33 = vadd.f32 %v1895_v55, %v1877_v62  ;;  %v1914_v26 = vadd.f32 %v1895_v55, %v1878_v1  ;;  %v1915_v23 = vadd.f32 %v1895_v55, %v1879_v3 }
 0x8e1   :  { %v1864_v0 = vpop.permute.xlu1 %1863  ;;  %v1557_v62 = vadd.f32 %v2694_v16, %v1521_v28  ;;  %v1558_v1 = vadd.f32 %v2694_v16, %v1522_v36 }
 0x8e2   :  { %v1928_v12 = vadd.f32 %v1912_v35, %v1545_v59  ;;  %v1929_v63 = vadd.f32 %v1913_v33, %v1546_v32  ;;  %v1930_v15 = vadd.f32 %v1914_v26, %v1547_v44  ;;  %v1931_v11 = vadd.f32 %v1915_v23, %v1548_v8 }
 0x8e3   :  { %v1880_v25 = vmul.f32 %v1864_v0, %v2585_v53  ;;  %v1881_v27 = vmul.f32 %v1864_v0, %v2588_v37  ;;  %v1882_v10 = vmul.f32 %v1864_v0, %v2593_v30  ;;  %v1883_v55 = vmul.f32 %v1864_v0, %v2596_v34 }
 0x8e4   :  { %v1944_v18 = vmax.f32 %v1928_v12, 0.0  ;;  %v1945_v13 = vmax.f32 %v1929_v63, 0.0  ;;  %v1946_v21 = vmax.f32 %v1930_v15, 0.0  ;;  %v1947_v52 = vmax.f32 %v1931_v11, 0.0 }
 0x8e5   :  { %v1916_v24 = vadd.f32 %v1900_v43, %v1880_v25  ;;  %v1917_v48 = vadd.f32 %v1900_v43, %v1881_v27  ;;  %v1918_v40 = vadd.f32 %v1900_v43, %v1882_v10  ;;  %v1919_v39 = vadd.f32 %v1900_v43, %v1883_v55  ;;  %v1869_v5 = vpop.permute.xlu0 %1868 }
 0x8e6   :  { %v1523_v53 = vmul.f32 %v1507_v6, %v2553_v57  ;;  %v1524_v37 = vmul.f32 %v1507_v6, %v2556_v38  ;;  %1960 = vst [vmem:[%s2797_s11] sm:$0xff] %v1944_v18  ;;  %1961 = vst [vmem:[%s2797_s11 + $0x8] sm:$0xff] %v1945_v13  ;;  %v1553_v30 = vadd.f32 %v2696_v29, %v1517_v58 }
 0x8e7   :  { %1962 = vst [vmem:[%s2797_s11 + $0x10] sm:$0xff] %v1946_v21  ;;  %1963 = vst [vmem:[%s2797_s11 + $0x18] sm:$0xff] %v1947_v52  ;;  %v1932_v46 = vadd.f32 %v1916_v24, %v1549_v20  ;;  %v1933_v56 = vadd.f32 %v1917_v48, %v1550_v4  ;;  %v1934_v57 = vadd.f32 %v1918_v40, %v1551_v54 }
 0x8e8   :  { %v1935_v38 = vadd.f32 %v1919_v39, %v1552_v17  ;;  %v1554_v34 = vadd.f32 %v2696_v29, %v1518_v50  ;;  %v1555_v43 = vadd.f32 %v2696_v29, %v1519_v2  ;;  %v1556_v6 = vadd.f32 %v2696_v29, %v1520_v22 }
 0x8e9   :  { %v1948_v41 = vmax.f32 %v1932_v46, 0.0  ;;  %v1949_v19 = vmax.f32 %v1933_v56, 0.0  ;;  %v1950_v59 = vmax.f32 %v1934_v57, 0.0  ;;  %v1874_v44 = vpop.permute.xlu1 %1873  ;;  %v1559_v3 = vadd.f32 %v2694_v16, %v1523_v53 }
 0x8ea   :  { %v1951_v32 = vmax.f32 %v1935_v38, 0.0  ;;  %v1888_v8 = vmul.f32 %v1874_v44, %v2625_v9  ;;  %v1889_v60 = vmul.f32 %v1874_v44, %v2628_v47  ;;  %v1890_v45 = vmul.f32 %v1874_v44, %v2633_v31  ;;  %v1910_v9 = vpop.permute.xlu0 %1909 }
 0x8eb   :  { %v1891_v61 = vmul.f32 %v1874_v44, %v2636_v14  ;;  %v1560_v29 = vadd.f32 %v2694_v16, %v1524_v37  ;;  %1964 = vst [vmem:[%s2797_s11 + $0x20] sm:$0xff] %v1948_v41  ;;  %1965 = vst [vmem:[%s2797_s11 + $0x28] sm:$0xff] %v1949_v19  ;;  %v1884_v20 = vmul.f32 %v1869_v5, %v2605_v7 }
 0x8ec   :  { %1966 = vst [vmem:[%s2797_s11 + $0x30] sm:$0xff] %v1950_v59  ;;  %1967 = vst [vmem:[%s2797_s11 + $0x38] sm:$0xff] %v1951_v32  ;;  %v1924_v47 = vadd.f32 %v1910_v9, %v1888_v8  ;;  %v1925_v31 = vadd.f32 %v1910_v9, %v1889_v60  ;;  %v1926_v14 = vadd.f32 %v1910_v9, %v1890_v45 }
 0x8ed   :  { %v1927_v16 = vadd.f32 %v1910_v9, %v1891_v61  ;;  %v1885_v4 = vmul.f32 %v1869_v5, %v2608_v42  ;;  %v1886_v54 = vmul.f32 %v1869_v5, %v2613_v49  ;;  %v1887_v17 = vmul.f32 %v1869_v5, %v2616_v51  ;;  %v1905_v35 = vpop.permute.xlu1 %1904 }
 0x8ee   :  { %v1940_v33 = vadd.f32 %v1924_v47, %v1557_v62  ;;  %v1941_v26 = vadd.f32 %v1925_v31, %v1558_v1  ;;  %v1942_v23 = vadd.f32 %v1926_v14, %v1559_v3  ;;  %v1920_v50 = vadd.f32 %v1905_v35, %v1884_v20 }
 0x8ef   :  { %v1943_v58 = vadd.f32 %v1927_v16, %v1560_v29  ;;  %v1921_v2 = vadd.f32 %v1905_v35, %v1885_v4  ;;  %v1922_v22 = vadd.f32 %v1905_v35, %v1886_v54  ;;  %v1923_v0 = vadd.f32 %v1905_v35, %v1887_v17 }
 0x8f0   :  { %v1956_v12 = vmax.f32 %v1940_v33, 0.0  ;;  %v1957_v63 = vmax.f32 %v1941_v26, 0.0  ;;  %v1958_v15 = vmax.f32 %v1942_v23, 0.0  ;;  %v1936_v7 = vadd.f32 %v1920_v50, %v1553_v30 }
 0x8f1   :  { %v1959_v11 = vmax.f32 %v1943_v58, 0.0  ;;  %v1937_v25 = vadd.f32 %v1921_v2, %v1554_v34  ;;  %v1938_v42 = vadd.f32 %v1922_v22, %v1555_v43  ;;  %v1939_v27 = vadd.f32 %v1923_v0, %v1556_v6 }
 0x8f2   :  { %1972 = vst [vmem:[%s2797_s11 + $0x60] sm:$0xff] %v1956_v12  ;;  %1973 = vst [vmem:[%s2797_s11 + $0x68] sm:$0xff] %v1957_v63  ;;  %v1952_v49 = vmax.f32 %v1936_v7, 0.0 }
 0x8f3   :  { %1974 = vst [vmem:[%s2797_s11 + $0x70] sm:$0xff] %v1958_v15  ;;  %1975 = vst [vmem:[%s2797_s11 + $0x78] sm:$0xff] %v1959_v11  ;;  %v1953_v51 = vmax.f32 %v1937_v25, 0.0  ;;  %v1954_v10 = vmax.f32 %v1938_v42, 0.0  ;;  %v1955_v55 = vmax.f32 %v1939_v27, 0.0 }
 0x8f4   :  { %1968 = vst [vmem:[%s2797_s11 + $0x40] sm:$0xff] %v1952_v49 }
 0x8f5   :  { %1969 = vst [vmem:[%s2797_s11 + $0x48] sm:$0xff] %v1953_v51  ;;  %1970 = vst [vmem:[%s2797_s11 + $0x50] sm:$0xff] %v1954_v10 }
 0x8f6   :  { %1971 = vst [vmem:[%s2797_s11 + $0x58] sm:$0xff] %v1955_v55 }
 0x8f7   :  { %1980 = vsyncpa [#allocation3], 1 }

</bundles_post_ra>
